<compile_context>
chip_gen: v5e
topology: v5e:2x2
jax: 0.10.0
libtpu: 0.0.40
codegen_flags: <defaults>
</compile_context>

<pallas_src>
import functools

import jax
import jax.numpy as jnp
from jax.experimental import pallas as pl
from jax.experimental.pallas import tpu as pltpu

K = 7          # conv kernel size
PAD = 3        # conv padding


def _round_up(x, m):
    return ((x + m - 1) // m) * m


def _spatial_attn_kernel(w_ref, b_ref, x_ref, o_ref, sum_ref, max_ref,
                         plane_ref, *, H, Wp, c_real, ct, needs_mask, pad_amt):
    # w_ref:     SMEM f32[98]              conv weight, [in_ch, ky, kx] order
    # b_ref:     SMEM f32[1]
    # x_ref:     VMEM x.dtype[nb, ct, H*Wp]  column-padded, lane-dense tile
    # o_ref:     VMEM x.dtype[nb, 1, H*Wp]   lane-dense output (cols PAD..PAD+W-1 valid)
    # sum_ref:   VMEM f32[nb, 1, H*Wp]       running channel sum
    # max_ref:   VMEM f32[nb, 1, H*Wp]       running channel max
    # plane_ref: VMEM f32[2, nb, 2*pad_amt + H*Wp]  stacked zero-extended avg/max planes
    HWp = H * Wp
    nb = x_ref.shape[0]
    c_idx = pl.program_id(1)

    @pl.when(c_idx == 0)
    def _init():
        sum_ref[...] = jnp.zeros(sum_ref.shape, sum_ref.dtype)
        max_ref[...] = jnp.full(max_ref.shape, -jnp.inf, max_ref.dtype)

    # Whole-tile channel reduction: single load, sublane (axis=1) reduces.
    xf = x_ref[...].astype(jnp.float32)
    if needs_mask:
        # Padded channels contribute 0 to the sum and -inf to the max.
        ch = jax.lax.broadcasted_iota(jnp.int32, xf.shape, 1) + c_idx * ct
        valid = ch < c_real
        xs = jnp.where(valid, xf, jnp.float32(0.0))
        xm = jnp.where(valid, xf, -jnp.inf)
    else:
        xs = xf
        xm = xf
    sum_ref[...] = sum_ref[...] + jnp.sum(xs, axis=1, keepdims=True)
    max_ref[...] = jnp.maximum(max_ref[...], jnp.max(xm, axis=1, keepdims=True))

    @pl.when(c_idx == pl.num_programs(1) - 1)
    def _finalize():
        avg = sum_ref[:, 0, :] * jnp.float32(1.0 / c_real)     # (nb, HWp)
        mx = max_ref[:, 0, :]                                  # (nb, HWp)

        # Stacked avg/max planes with lane-aligned zero strips top & bottom so
        # every (dy, dx) tap is a purely static, in-bounds lane shift.
        zeros_pad = jnp.zeros((2, nb, pad_amt), jnp.float32)
        plane_ref[:, :, 0:pad_amt] = zeros_pad
        plane_ref[:, :, pad_amt + HWp:pad_amt + HWp + pad_amt] = zeros_pad
        plane_ref[0, :, pad_amt:pad_amt + HWp] = avg
        plane_ref[1, :, pad_amt:pad_amt + HWp] = mx

        sel = jax.lax.broadcasted_iota(jnp.int32, (2, 1, 1), 0)
        is_avg = sel == 0

        # 49 taps: ONE slice of the stacked plane per tap (no wrap masks),
        # per-half weight applied via a tiny (2,1,1) select.
        acc = jnp.zeros((2, nb, HWp), jnp.float32)
        for dy in range(-PAD, PAD + 1):
            for dx in range(-PAD, PAD + 1):
                ky = dy + PAD
                kx = dx + PAD
                w_a = w_ref[ky * K + kx]               # weight on avg channel
                w_m = w_ref[K * K + ky * K + kx]       # weight on max channel
                wvec = jnp.where(is_avg, w_a, w_m)
                start = pad_amt + dy * Wp + dx         # static lane shift
                acc = acc + wvec * plane_ref[:, :, start:start + HWp]

        res = acc[0] + acc[1] + b_ref[0]
        o_ref[:, 0, :] = jax.nn.sigmoid(res).astype(o_ref.dtype)


def _tpu_generation():
    try:
        kind = jax.devices()[0].device_kind.lower()
    except Exception:
        return "other"
    if "v5 lite" in kind or "v5e" in kind or "v5lite" in kind:
        return "v5e"
    if "v6" in kind:
        return "v6e"
    if "v7" in kind or "tpu7" in kind or "7x" in kind:
        return "v7x"
    return "other"


def _choose_tiles(N, C, HWp, elem_bytes, gen):
    """Generation-aware (batch tile, channel tile, padded C, mask?) choice."""
    # Per-pipeline-buffer budget (inputs are double-buffered by Pallas).
    budgets = {"v5e": 12 << 20, "v6e": 20 << 20, "v7x": 10 << 20}
    budget = budgets.get(gen, 6 << 20)

    # Channel tile: full C if it fits, else a multiple-of-8 divisor of padded C.
    if C * HWp * elem_bytes <= budget:
        c_pad, ct = C, C
    else:
        c_pad = _round_up(C, 8)
        cap = max(8, budget // (HWp * elem_bytes))
        ct = 8
        d = 8
        while d <= c_pad:
            if c_pad % d == 0 and d <= cap:
                ct = d
            d += 8
    needs_mask = c_pad != C

    # Batch tile: as large as the buffer budget allows, capped so the 49-tap
    # finalize accumulator (2*nb*HWp f32) stays register-friendly.
    cap = max(1, budget // max(1, ct * HWp * elem_bytes))
    cap = min(cap, max(1, (64 * 1024) // max(1, 2 * HWp * 4)))
    if gen == "v7x" and N >= 2:
        cap = min(cap, max(1, N // 2))     # >= 2 grid steps for 2 TensorCores
    divs = [d for d in range(1, N + 1) if N % d == 0 and d <= cap]
    nb = max(divs) if divs else 1
    if gen == "v7x":
        even = [d for d in divs if (N // d) % 2 == 0]
        if even:
            nb = max(even)                 # even step count across the 2 TCs
    return nb, ct, c_pad, needs_mask


def spatial_attention(x, weight, bias):
    """x: (N, C, H, W). weight: (1, 2, 7, 7). bias: (1,)."""
    N, C, H, W = x.shape
    Wp = W + 2 * PAD
    HWp = H * Wp

    gen = _tpu_generation()
    elem_bytes = jnp.dtype(x.dtype).itemsize
    nb, ct, c_pad, needs_mask = _choose_tiles(N, C, HWp, elem_bytes, gen)

    # Column-pad W (and channel-pad C when needed) once in the wrapper; keep
    # x in its native dtype so the DMA-bound reduce phase moves minimal bytes.
    xp = jnp.pad(x, ((0, 0), (0, c_pad - C), (0, 0), (PAD, PAD)))
    xp_flat = xp.reshape(N, c_pad, HWp)

    w_flat = weight.reshape(-1).astype(jnp.float32)   # (98,) [in_ch, ky, kx]
    b = bias.reshape(-1).astype(jnp.float32)

    pad_amt = _round_up(3 * Wp + PAD, 128)            # lane-aligned zero strips
    grid = (N // nb, c_pad // ct)

    kernel = functools.partial(
        _spatial_attn_kernel, H=H, Wp=Wp, c_real=C, ct=ct,
        needs_mask=needs_mask, pad_amt=pad_amt)

    vmem_limits = {"v5e": 64 << 20, "v6e": 96 << 20, "v7x": 44 << 20}
    cp_kwargs = dict(dimension_semantics=("parallel", "arbitrary"))
    if gen in vmem_limits:
        cp_kwargs["vmem_limit_bytes"] = vmem_limits[gen]

    out_flat = pl.pallas_call(
        kernel,
        out_shape=jax.ShapeDtypeStruct((N, 1, HWp), x.dtype),
        grid_spec=pltpu.PrefetchScalarGridSpec(
            num_scalar_prefetch=0,
            grid=grid,
            in_specs=[
                pl.BlockSpec(memory_space=pltpu.MemorySpace.SMEM),   # weight
                pl.BlockSpec(memory_space=pltpu.MemorySpace.SMEM),   # bias
                pl.BlockSpec((nb, ct, HWp), lambda n, c: (n, c, 0)),  # x
            ],
            out_specs=pl.BlockSpec((nb, 1, HWp), lambda n, c: (n, 0, 0)),
            scratch_shapes=[
                pltpu.VMEM((nb, 1, HWp), jnp.float32),                 # sum
                pltpu.VMEM((nb, 1, HWp), jnp.float32),                 # max
                pltpu.VMEM((2, nb, 2 * pad_amt + HWp), jnp.float32),   # planes
            ],
        ),
        compiler_params=pltpu.CompilerParams(**cp_kwargs),
    )(w_flat, b, xp_flat)

    # Valid conv outputs live at columns [PAD, PAD+W) of the stride-Wp plane.
    return out_flat.reshape(N, 1, H, Wp)[:, :, :, PAD:PAD + W]


def _reference(x, weight, bias):
    """Plain-JAX reference of the PyTorch forward (NCHW conv)."""
    avg = jnp.mean(x, axis=1, keepdims=True)
    mx = jnp.max(x, axis=1, keepdims=True)
    cat = jnp.concatenate([avg, mx], axis=1)
    out = jax.lax.conv_general_dilated(
        cat, weight, window_strides=(1, 1), padding=((PAD, PAD), (PAD, PAD)),
        dimension_numbers=("NCHW", "OIHW", "NCHW"))
    out = out + bias.reshape(1, 1, 1, 1)
    return jax.nn.sigmoid(out)


if __name__ == "__main__":
    key = jax.random.PRNGKey(0)
    kx, kw, kb = jax.random.split(key, 3)

    # small shapes consistent with the module's forward
    N, C, H, W = 2, 4, 16, 16
    x = jax.random.normal(kx, (N, C, H, W), dtype=jnp.float32)

    # deterministic Conv2d(2, 1, 7, padding=3) parameters (PyTorch-style init)
    fan_in = 2 * K * K
    bound = 1.0 / (fan_in ** 0.5)
    weight = jax.random.uniform(kw, (1, 2, K, K), jnp.float32, -bound, bound)
    bias = jax.random.uniform(kb, (1,), jnp.float32, -bound, bound)

    out = spatial_attention(x, weight, bias)
    out = jax.block_until_ready(out)

    ref = _reference(x, weight, bias)
    assert out.shape == (N, 1, H, W)
    assert jnp.allclose(out, ref, atol=1e-4, rtol=1e-4), "mismatch vs reference"

    print("KERNEL_OK")
</pallas_src>

<mosaic_0001>
module attributes {stable_mosaic.version = 11 : i64} {
  func.func @_spatial_attn_kernel(%arg0: i32, %arg1: i32, %arg2: memref<98xf32, #tpu.memory_space<smem>>, %arg3: memref<1xf32, #tpu.memory_space<smem>>, %arg4: memref<2x4x352xf32, #tpu.memory_space<vmem>>, %arg5: memref<2x1x352xf32, #tpu.memory_space<vmem>>, %arg6: memref<2x1x352xf32, #tpu.memory_space<vmem>>, %arg7: memref<2x1x352xf32, #tpu.memory_space<vmem>>, %arg8: memref<2x2x608xf32, #tpu.memory_space<vmem>>) attributes {dimension_semantics = [#tpu.dimension_semantics<parallel>, #tpu.dimension_semantics<arbitrary>], iteration_bounds = array<i64: 1, 1>, scalar_prefetch = 0 : i64, scratch_operands = 3 : i64, tpu.core_type = #tpu.core_type<tc>, window_params = [{transform_indices = @transform_0, window_bounds = array<i64: 98>}, {transform_indices = @transform_1, window_bounds = array<i64: 1>}, {transform_indices = @transform_2, window_bounds = array<i64: 2, 4, 352>}, {transform_indices = @transform_3, window_bounds = array<i64: 2, 1, 352>}]} {
    %c0_i32 = arith.constant 0 : i32
    %0 = arith.cmpi eq, %arg1, %c0_i32 : i32
    %1 = arith.extui %0 : i1 to i32
    %c0_i32_0 = arith.constant 0 : i32
    %2 = arith.cmpi ne, %1, %c0_i32_0 : i32
    scf.if %2 {
      %cst_18 = arith.constant 0.000000e+00 : f32
      %17 = vector.broadcast %cst_18 : f32 to vector<2x1x352xf32>
      %c0_19 = arith.constant 0 : index
      %c0_20 = arith.constant 0 : index
      %c0_21 = arith.constant 0 : index
      %18 = vector.load %arg6[%c0_19, %c0_20, %c0_21] : memref<2x1x352xf32, #tpu.memory_space<vmem>>, vector<2x1x352xf32>
      tpu.vector_store %arg6[%c0_19, %c0_20, %c0_21], %17 {strides = array<i32>} : memref<2x1x352xf32, #tpu.memory_space<vmem>>, vector<2x1x352xf32>,
      %cst_22 = arith.constant 0xFF800000 : f32
      %19 = vector.broadcast %cst_22 : f32 to vector<2x1x352xf32>
      %c0_23 = arith.constant 0 : index
      %c0_24 = arith.constant 0 : index
      %c0_25 = arith.constant 0 : index
      %20 = vector.load %arg7[%c0_23, %c0_24, %c0_25] : memref<2x1x352xf32, #tpu.memory_space<vmem>>, vector<2x1x352xf32>
      tpu.vector_store %arg7[%c0_23, %c0_24, %c0_25], %19 {strides = array<i32>} : memref<2x1x352xf32, #tpu.memory_space<vmem>>, vector<2x1x352xf32>,
    } else {
    }
    %c0 = arith.constant 0 : index
    %c0_1 = arith.constant 0 : index
    %c0_2 = arith.constant 0 : index
    %3 = vector.load %arg4[%c0, %c0_1, %c0_2] : memref<2x4x352xf32, #tpu.memory_space<vmem>>, vector<2x4x352xf32>
    %c0_3 = arith.constant 0 : index
    %c0_4 = arith.constant 0 : index
    %c0_5 = arith.constant 0 : index
    %4 = vector.load %arg6[%c0_3, %c0_4, %c0_5] : memref<2x1x352xf32, #tpu.memory_space<vmem>>, vector<2x1x352xf32>
    %cst = arith.constant dense<0.000000e+00> : vector<2x352xf32>
    %5 = vector.multi_reduction <add>, %3, %cst [1] : vector<2x4x352xf32> to vector<2x352xf32>
    %6 = vector.shape_cast %5 : vector<2x352xf32> to vector<2x1x352xf32>
    %7 = arith.addf %4, %6 : vector<2x1x352xf32>
    %c0_6 = arith.constant 0 : index
    %c0_7 = arith.constant 0 : index
    %c0_8 = arith.constant 0 : index
    %8 = vector.load %arg6[%c0_6, %c0_7, %c0_8] : memref<2x1x352xf32, #tpu.memory_space<vmem>>, vector<2x1x352xf32>
    tpu.vector_store %arg6[%c0_6, %c0_7, %c0_8], %7 {strides = array<i32>} : memref<2x1x352xf32, #tpu.memory_space<vmem>>, vector<2x1x352xf32>,
    %c0_9 = arith.constant 0 : index
    %c0_10 = arith.constant 0 : index
    %c0_11 = arith.constant 0 : index
    %9 = vector.load %arg7[%c0_9, %c0_10, %c0_11] : memref<2x1x352xf32, #tpu.memory_space<vmem>>, vector<2x1x352xf32>
    %cst_12 = arith.constant dense<0xFF800000> : vector<2x352xf32>
    %10 = vector.multi_reduction <maximumf>, %3, %cst_12 [1] : vector<2x4x352xf32> to vector<2x352xf32>
    %11 = vector.shape_cast %10 : vector<2x352xf32> to vector<2x1x352xf32>
    %12 = arith.maximumf %9, %11 : vector<2x1x352xf32>
    %c0_13 = arith.constant 0 : index
    %c0_14 = arith.constant 0 : index
    %c0_15 = arith.constant 0 : index
    %13 = vector.load %arg7[%c0_13, %c0_14, %c0_15] : memref<2x1x352xf32, #tpu.memory_space<vmem>>, vector<2x1x352xf32>
    tpu.vector_store %arg7[%c0_13, %c0_14, %c0_15], %12 {strides = array<i32>} : memref<2x1x352xf32, #tpu.memory_space<vmem>>, vector<2x1x352xf32>,
    %c0_i32_16 = arith.constant 0 : i32
    %14 = arith.cmpi eq, %arg1, %c0_i32_16 : i32
    %15 = arith.extui %14 : i1 to i32
    %c0_i32_17 = arith.constant 0 : i32
    %16 = arith.cmpi ne, %15, %c0_i32_17 : i32
    scf.if %16 {
      %c0_18 = arith.constant 0 : index
      %c0_19 = arith.constant 0 : index
      %c0_20 = arith.constant 0 : index
      %17 = vector.load %arg6[%c0_18, %c0_19, %c0_20] : memref<2x1x352xf32, #tpu.memory_space<vmem>>, vector<2x1x352xf32>
      %18 = vector.shape_cast %17 : vector<2x1x352xf32> to vector<2x352xf32>
      %cst_21 = arith.constant 2.500000e-01 : f32
      %19 = vector.broadcast %cst_21 : f32 to vector<2x352xf32>
      %20 = arith.mulf %18, %19 : vector<2x352xf32>
      %c0_22 = arith.constant 0 : index
      %c0_23 = arith.constant 0 : index
      %c0_24 = arith.constant 0 : index
      %21 = vector.load %arg7[%c0_22, %c0_23, %c0_24] : memref<2x1x352xf32, #tpu.memory_space<vmem>>, vector<2x1x352xf32>
      %22 = vector.shape_cast %21 : vector<2x1x352xf32> to vector<2x352xf32>
      %cst_25 = arith.constant 0.000000e+00 : f32
      %23 = vector.broadcast %cst_25 : f32 to vector<2x2x128xf32>
      %c0_26 = arith.constant 0 : index
      %c0_27 = arith.constant 0 : index
      %c0_28 = arith.constant 0 : index
      %24 = vector.load %arg8[%c0_26, %c0_27, %c0_28] : memref<2x2x608xf32, #tpu.memory_space<vmem>>, vector<2x2x128xf32>
      tpu.vector_store %arg8[%c0_26, %c0_27, %c0_28], %23 {strides = array<i32>} : memref<2x2x608xf32, #tpu.memory_space<vmem>>, vector<2x2x128xf32>,
      %c0_29 = arith.constant 0 : index
      %c0_30 = arith.constant 0 : index
      %c480 = arith.constant 480 : index
      %25 = vector.load %arg8[%c0_29, %c0_30, %c480] : memref<2x2x608xf32, #tpu.memory_space<vmem>>, vector<2x2x128xf32>
      tpu.vector_store %arg8[%c0_29, %c0_30, %c480], %23 {strides = array<i32>} : memref<2x2x608xf32, #tpu.memory_space<vmem>>, vector<2x2x128xf32>,
      %c0_31 = arith.constant 0 : index
      %c0_32 = arith.constant 0 : index
      %c128 = arith.constant 128 : index
      %26 = vector.load %arg8[%c0_31, %c0_32, %c128] : memref<2x2x608xf32, #tpu.memory_space<vmem>>, vector<1x2x352xf32>
      %27 = vector.shape_cast %26 : vector<1x2x352xf32> to vector<2x352xf32>
      %28 = vector.shape_cast %20 : vector<2x352xf32> to vector<1x2x352xf32>
      tpu.vector_store %arg8[%c0_31, %c0_32, %c128], %28 {strides = array<i32>} : memref<2x2x608xf32, #tpu.memory_space<vmem>>, vector<1x2x352xf32>,
      %c1 = arith.constant 1 : index
      %c0_33 = arith.constant 0 : index
      %c128_34 = arith.constant 128 : index
      %29 = vector.load %arg8[%c1, %c0_33, %c128_34] : memref<2x2x608xf32, #tpu.memory_space<vmem>>, vector<1x2x352xf32>
      %30 = vector.shape_cast %29 : vector<1x2x352xf32> to vector<2x352xf32>
      %31 = vector.shape_cast %22 : vector<2x352xf32> to vector<1x2x352xf32>
      tpu.vector_store %arg8[%c1, %c0_33, %c128_34], %31 {strides = array<i32>} : memref<2x2x608xf32, #tpu.memory_space<vmem>>, vector<1x2x352xf32>,
      %32 = tpu.iota {dimensions = array<i32: 0>} : vector<2x1x1xi32>
      %c0_i32_35 = arith.constant 0 : i32
      %33 = vector.broadcast %c0_i32_35 : i32 to vector<2x1x1xi32>
      %34 = arith.cmpi eq, %32, %33 : vector<2x1x1xi32>
      %cst_36 = arith.constant 0.000000e+00 : f32
      %35 = vector.broadcast %cst_36 : f32 to vector<2x2x352xf32>
      %c0_37 = arith.constant 0 : index
      %36 = memref.load %arg2[%c0_37] : memref<98xf32, #tpu.memory_space<smem>>
      %c49 = arith.constant 49 : index
      %37 = memref.load %arg2[%c49] : memref<98xf32, #tpu.memory_space<smem>>
      %38 = vector.broadcast %36 : f32 to vector<2x1x1xf32>
      %39 = vector.broadcast %37 : f32 to vector<2x1x1xf32>
      %40 = arith.select %34, %38, %39 : vector<2x1x1xi1>, vector<2x1x1xf32>
      %c0_38 = arith.constant 0 : index
      %c0_39 = arith.constant 0 : index
      %c59 = arith.constant 59 : index
      %41 = vector.load %arg8[%c0_38, %c0_39, %c59] : memref<2x2x608xf32, #tpu.memory_space<vmem>>, vector<2x2x352xf32>
      %42 = vector.broadcast %40 : vector<2x1x1xf32> to vector<2x2x352xf32>
      %43 = arith.mulf %42, %41 : vector<2x2x352xf32>
      %44 = arith.addf %35, %43 : vector<2x2x352xf32>
      %c1_40 = arith.constant 1 : index
      %45 = memref.load %arg2[%c1_40] : memref<98xf32, #tpu.memory_space<smem>>
      %c50 = arith.constant 50 : index
      %46 = memref.load %arg2[%c50] : memref<98xf32, #tpu.memory_space<smem>>
      %47 = vector.broadcast %45 : f32 to vector<2x1x1xf32>
      %48 = vector.broadcast %46 : f32 to vector<2x1x1xf32>
      %49 = arith.select %34, %47, %48 : vector<2x1x1xi1>, vector<2x1x1xf32>
      %c0_41 = arith.constant 0 : index
      %c0_42 = arith.constant 0 : index
      %c60 = arith.constant 60 : index
      %50 = vector.load %arg8[%c0_41, %c0_42, %c60] : memref<2x2x608xf32, #tpu.memory_space<vmem>>, vector<2x2x352xf32>
      %51 = vector.broadcast %49 : vector<2x1x1xf32> to vector<2x2x352xf32>
      %52 = arith.mulf %51, %50 : vector<2x2x352xf32>
      %53 = arith.addf %44, %52 : vector<2x2x352xf32>
      %c2 = arith.constant 2 : index
      %54 = memref.load %arg2[%c2] : memref<98xf32, #tpu.memory_space<smem>>
      %c51 = arith.constant 51 : index
      %55 = memref.load %arg2[%c51] : memref<98xf32, #tpu.memory_space<smem>>
      %56 = vector.broadcast %54 : f32 to vector<2x1x1xf32>
      %57 = vector.broadcast %55 : f32 to vector<2x1x1xf32>
      %58 = arith.select %34, %56, %57 : vector<2x1x1xi1>, vector<2x1x1xf32>
      %c0_43 = arith.constant 0 : index
      %c0_44 = arith.constant 0 : index
      %c61 = arith.constant 61 : index
      %59 = vector.load %arg8[%c0_43, %c0_44, %c61] : memref<2x2x608xf32, #tpu.memory_space<vmem>>, vector<2x2x352xf32>
      %60 = vector.broadcast %58 : vector<2x1x1xf32> to vector<2x2x352xf32>
      %61 = arith.mulf %60, %59 : vector<2x2x352xf32>
      %62 = arith.addf %53, %61 : vector<2x2x352xf32>
      %c3 = arith.constant 3 : index
      %63 = memref.load %arg2[%c3] : memref<98xf32, #tpu.memory_space<smem>>
      %c52 = arith.constant 52 : index
      %64 = memref.load %arg2[%c52] : memref<98xf32, #tpu.memory_space<smem>>
      %65 = vector.broadcast %63 : f32 to vector<2x1x1xf32>
      %66 = vector.broadcast %64 : f32 to vector<2x1x1xf32>
      %67 = arith.select %34, %65, %66 : vector<2x1x1xi1>, vector<2x1x1xf32>
      %c0_45 = arith.constant 0 : index
      %c0_46 = arith.constant 0 : index
      %c62 = arith.constant 62 : index
      %68 = vector.load %arg8[%c0_45, %c0_46, %c62] : memref<2x2x608xf32, #tpu.memory_space<vmem>>, vector<2x2x352xf32>
      %69 = vector.broadcast %67 : vector<2x1x1xf32> to vector<2x2x352xf32>
      %70 = arith.mulf %69, %68 : vector<2x2x352xf32>
      %71 = arith.addf %62, %70 : vector<2x2x352xf32>
      %c4 = arith.constant 4 : index
      %72 = memref.load %arg2[%c4] : memref<98xf32, #tpu.memory_space<smem>>
      %c53 = arith.constant 53 : index
      %73 = memref.load %arg2[%c53] : memref<98xf32, #tpu.memory_space<smem>>
      %74 = vector.broadcast %72 : f32 to vector<2x1x1xf32>
      %75 = vector.broadcast %73 : f32 to vector<2x1x1xf32>
      %76 = arith.select %34, %74, %75 : vector<2x1x1xi1>, vector<2x1x1xf32>
      %c0_47 = arith.constant 0 : index
      %c0_48 = arith.constant 0 : index
      %c63 = arith.constant 63 : index
      %77 = vector.load %arg8[%c0_47, %c0_48, %c63] : memref<2x2x608xf32, #tpu.memory_space<vmem>>, vector<2x2x352xf32>
      %78 = vector.broadcast %76 : vector<2x1x1xf32> to vector<2x2x352xf32>
      %79 = arith.mulf %78, %77 : vector<2x2x352xf32>
      %80 = arith.addf %71, %79 : vector<2x2x352xf32>
      %c5 = arith.constant 5 : index
      %81 = memref.load %arg2[%c5] : memref<98xf32, #tpu.memory_space<smem>>
      %c54 = arith.constant 54 : index
      %82 = memref.load %arg2[%c54] : memref<98xf32, #tpu.memory_space<smem>>
      %83 = vector.broadcast %81 : f32 to vector<2x1x1xf32>
      %84 = vector.broadcast %82 : f32 to vector<2x1x1xf32>
      %85 = arith.select %34, %83, %84 : vector<2x1x1xi1>, vector<2x1x1xf32>
      %c0_49 = arith.constant 0 : index
      %c0_50 = arith.constant 0 : index
      %c64 = arith.constant 64 : index
      %86 = vector.load %arg8[%c0_49, %c0_50, %c64] : memref<2x2x608xf32, #tpu.memory_space<vmem>>, vector<2x2x352xf32>
      %87 = vector.broadcast %85 : vector<2x1x1xf32> to vector<2x2x352xf32>
      %88 = arith.mulf %87, %86 : vector<2x2x352xf32>
      %89 = arith.addf %80, %88 : vector<2x2x352xf32>
      %c6 = arith.constant 6 : index
      %90 = memref.load %arg2[%c6] : memref<98xf32, #tpu.memory_space<smem>>
      %c55 = arith.constant 55 : index
      %91 = memref.load %arg2[%c55] : memref<98xf32, #tpu.memory_space<smem>>
      %92 = vector.broadcast %90 : f32 to vector<2x1x1xf32>
      %93 = vector.broadcast %91 : f32 to vector<2x1x1xf32>
      %94 = arith.select %34, %92, %93 : vector<2x1x1xi1>, vector<2x1x1xf32>
      %c0_51 = arith.constant 0 : index
      %c0_52 = arith.constant 0 : index
      %c65 = arith.constant 65 : index
      %95 = vector.load %arg8[%c0_51, %c0_52, %c65] : memref<2x2x608xf32, #tpu.memory_space<vmem>>, vector<2x2x352xf32>
      %96 = vector.broadcast %94 : vector<2x1x1xf32> to vector<2x2x352xf32>
      %97 = arith.mulf %96, %95 : vector<2x2x352xf32>
      %98 = arith.addf %89, %97 : vector<2x2x352xf32>
      %c7 = arith.constant 7 : index
      %99 = memref.load %arg2[%c7] : memref<98xf32, #tpu.memory_space<smem>>
      %c56 = arith.constant 56 : index
      %100 = memref.load %arg2[%c56] : memref<98xf32, #tpu.memory_space<smem>>
      %101 = vector.broadcast %99 : f32 to vector<2x1x1xf32>
      %102 = vector.broadcast %100 : f32 to vector<2x1x1xf32>
      %103 = arith.select %34, %101, %102 : vector<2x1x1xi1>, vector<2x1x1xf32>
      %c0_53 = arith.constant 0 : index
      %c0_54 = arith.constant 0 : index
      %c81 = arith.constant 81 : index
      %104 = vector.load %arg8[%c0_53, %c0_54, %c81] : memref<2x2x608xf32, #tpu.memory_space<vmem>>, vector<2x2x352xf32>
      %105 = vector.broadcast %103 : vector<2x1x1xf32> to vector<2x2x352xf32>
      %106 = arith.mulf %105, %104 : vector<2x2x352xf32>
      %107 = arith.addf %98, %106 : vector<2x2x352xf32>
      %c8 = arith.constant 8 : index
      %108 = memref.load %arg2[%c8] : memref<98xf32, #tpu.memory_space<smem>>
      %c57 = arith.constant 57 : index
      %109 = memref.load %arg2[%c57] : memref<98xf32, #tpu.memory_space<smem>>
      %110 = vector.broadcast %108 : f32 to vector<2x1x1xf32>
      %111 = vector.broadcast %109 : f32 to vector<2x1x1xf32>
      %112 = arith.select %34, %110, %111 : vector<2x1x1xi1>, vector<2x1x1xf32>
      %c0_55 = arith.constant 0 : index
      %c0_56 = arith.constant 0 : index
      %c82 = arith.constant 82 : index
      %113 = vector.load %arg8[%c0_55, %c0_56, %c82] : memref<2x2x608xf32, #tpu.memory_space<vmem>>, vector<2x2x352xf32>
      %114 = vector.broadcast %112 : vector<2x1x1xf32> to vector<2x2x352xf32>
      %115 = arith.mulf %114, %113 : vector<2x2x352xf32>
      %116 = arith.addf %107, %115 : vector<2x2x352xf32>
      %c9 = arith.constant 9 : index
      %117 = memref.load %arg2[%c9] : memref<98xf32, #tpu.memory_space<smem>>
      %c58 = arith.constant 58 : index
      %118 = memref.load %arg2[%c58] : memref<98xf32, #tpu.memory_space<smem>>
      %119 = vector.broadcast %117 : f32 to vector<2x1x1xf32>
      %120 = vector.broadcast %118 : f32 to vector<2x1x1xf32>
      %121 = arith.select %34, %119, %120 : vector<2x1x1xi1>, vector<2x1x1xf32>
      %c0_57 = arith.constant 0 : index
      %c0_58 = arith.constant 0 : index
      %c83 = arith.constant 83 : index
      %122 = vector.load %arg8[%c0_57, %c0_58, %c83] : memref<2x2x608xf32, #tpu.memory_space<vmem>>, vector<2x2x352xf32>
      %123 = vector.broadcast %121 : vector<2x1x1xf32> to vector<2x2x352xf32>
      %124 = arith.mulf %123, %122 : vector<2x2x352xf32>
      %125 = arith.addf %116, %124 : vector<2x2x352xf32>
      %c10 = arith.constant 10 : index
      %126 = memref.load %arg2[%c10] : memref<98xf32, #tpu.memory_space<smem>>
      %c59_59 = arith.constant 59 : index
      %127 = memref.load %arg2[%c59_59] : memref<98xf32, #tpu.memory_space<smem>>
      %128 = vector.broadcast %126 : f32 to vector<2x1x1xf32>
      %129 = vector.broadcast %127 : f32 to vector<2x1x1xf32>
      %130 = arith.select %34, %128, %129 : vector<2x1x1xi1>, vector<2x1x1xf32>
      %c0_60 = arith.constant 0 : index
      %c0_61 = arith.constant 0 : index
      %c84 = arith.constant 84 : index
      %131 = vector.load %arg8[%c0_60, %c0_61, %c84] : memref<2x2x608xf32, #tpu.memory_space<vmem>>, vector<2x2x352xf32>
      %132 = vector.broadcast %130 : vector<2x1x1xf32> to vector<2x2x352xf32>
      %133 = arith.mulf %132, %131 : vector<2x2x352xf32>
      %134 = arith.addf %125, %133 : vector<2x2x352xf32>
      %c11 = arith.constant 11 : index
      %135 = memref.load %arg2[%c11] : memref<98xf32, #tpu.memory_space<smem>>
      %c60_62 = arith.constant 60 : index
      %136 = memref.load %arg2[%c60_62] : memref<98xf32, #tpu.memory_space<smem>>
      %137 = vector.broadcast %135 : f32 to vector<2x1x1xf32>
      %138 = vector.broadcast %136 : f32 to vector<2x1x1xf32>
      %139 = arith.select %34, %137, %138 : vector<2x1x1xi1>, vector<2x1x1xf32>
      %c0_63 = arith.constant 0 : index
      %c0_64 = arith.constant 0 : index
      %c85 = arith.constant 85 : index
      %140 = vector.load %arg8[%c0_63, %c0_64, %c85] : memref<2x2x608xf32, #tpu.memory_space<vmem>>, vector<2x2x352xf32>
      %141 = vector.broadcast %139 : vector<2x1x1xf32> to vector<2x2x352xf32>
      %142 = arith.mulf %141, %140 : vector<2x2x352xf32>
      %143 = arith.addf %134, %142 : vector<2x2x352xf32>
      %c12 = arith.constant 12 : index
      %144 = memref.load %arg2[%c12] : memref<98xf32, #tpu.memory_space<smem>>
      %c61_65 = arith.constant 61 : index
      %145 = memref.load %arg2[%c61_65] : memref<98xf32, #tpu.memory_space<smem>>
      %146 = vector.broadcast %144 : f32 to vector<2x1x1xf32>
      %147 = vector.broadcast %145 : f32 to vector<2x1x1xf32>
      %148 = arith.select %34, %146, %147 : vector<2x1x1xi1>, vector<2x1x1xf32>
      %c0_66 = arith.constant 0 : index
      %c0_67 = arith.constant 0 : index
      %c86 = arith.constant 86 : index
      %149 = vector.load %arg8[%c0_66, %c0_67, %c86] : memref<2x2x608xf32, #tpu.memory_space<vmem>>, vector<2x2x352xf32>
      %150 = vector.broadcast %148 : vector<2x1x1xf32> to vector<2x2x352xf32>
      %151 = arith.mulf %150, %149 : vector<2x2x352xf32>
      %152 = arith.addf %143, %151 : vector<2x2x352xf32>
      %c13 = arith.constant 13 : index
      %153 = memref.load %arg2[%c13] : memref<98xf32, #tpu.memory_space<smem>>
      %c62_68 = arith.constant 62 : index
      %154 = memref.load %arg2[%c62_68] : memref<98xf32, #tpu.memory_space<smem>>
      %155 = vector.broadcast %153 : f32 to vector<2x1x1xf32>
      %156 = vector.broadcast %154 : f32 to vector<2x1x1xf32>
      %157 = arith.select %34, %155, %156 : vector<2x1x1xi1>, vector<2x1x1xf32>
      %c0_69 = arith.constant 0 : index
      %c0_70 = arith.constant 0 : index
      %c87 = arith.constant 87 : index
      %158 = vector.load %arg8[%c0_69, %c0_70, %c87] : memref<2x2x608xf32, #tpu.memory_space<vmem>>, vector<2x2x352xf32>
      %159 = vector.broadcast %157 : vector<2x1x1xf32> to vector<2x2x352xf32>
      %160 = arith.mulf %159, %158 : vector<2x2x352xf32>
      %161 = arith.addf %152, %160 : vector<2x2x352xf32>
      %c14 = arith.constant 14 : index
      %162 = memref.load %arg2[%c14] : memref<98xf32, #tpu.memory_space<smem>>
      %c63_71 = arith.constant 63 : index
      %163 = memref.load %arg2[%c63_71] : memref<98xf32, #tpu.memory_space<smem>>
      %164 = vector.broadcast %162 : f32 to vector<2x1x1xf32>
      %165 = vector.broadcast %163 : f32 to vector<2x1x1xf32>
      %166 = arith.select %34, %164, %165 : vector<2x1x1xi1>, vector<2x1x1xf32>
      %c0_72 = arith.constant 0 : index
      %c0_73 = arith.constant 0 : index
      %c103 = arith.constant 103 : index
      %167 = vector.load %arg8[%c0_72, %c0_73, %c103] : memref<2x2x608xf32, #tpu.memory_space<vmem>>, vector<2x2x352xf32>
      %168 = vector.broadcast %166 : vector<2x1x1xf32> to vector<2x2x352xf32>
      %169 = arith.mulf %168, %167 : vector<2x2x352xf32>
      %170 = arith.addf %161, %169 : vector<2x2x352xf32>
      %c15 = arith.constant 15 : index
      %171 = memref.load %arg2[%c15] : memref<98xf32, #tpu.memory_space<smem>>
      %c64_74 = arith.constant 64 : index
      %172 = memref.load %arg2[%c64_74] : memref<98xf32, #tpu.memory_space<smem>>
      %173 = vector.broadcast %171 : f32 to vector<2x1x1xf32>
      %174 = vector.broadcast %172 : f32 to vector<2x1x1xf32>
      %175 = arith.select %34, %173, %174 : vector<2x1x1xi1>, vector<2x1x1xf32>
      %c0_75 = arith.constant 0 : index
      %c0_76 = arith.constant 0 : index
      %c104 = arith.constant 104 : index
      %176 = vector.load %arg8[%c0_75, %c0_76, %c104] : memref<2x2x608xf32, #tpu.memory_space<vmem>>, vector<2x2x352xf32>
      %177 = vector.broadcast %175 : vector<2x1x1xf32> to vector<2x2x352xf32>
      %178 = arith.mulf %177, %176 : vector<2x2x352xf32>
      %179 = arith.addf %170, %178 : vector<2x2x352xf32>
      %c16 = arith.constant 16 : index
      %180 = memref.load %arg2[%c16] : memref<98xf32, #tpu.memory_space<smem>>
      %c65_77 = arith.constant 65 : index
      %181 = memref.load %arg2[%c65_77] : memref<98xf32, #tpu.memory_space<smem>>
      %182 = vector.broadcast %180 : f32 to vector<2x1x1xf32>
      %183 = vector.broadcast %181 : f32 to vector<2x1x1xf32>
      %184 = arith.select %34, %182, %183 : vector<2x1x1xi1>, vector<2x1x1xf32>
      %c0_78 = arith.constant 0 : index
      %c0_79 = arith.constant 0 : index
      %c105 = arith.constant 105 : index
      %185 = vector.load %arg8[%c0_78, %c0_79, %c105] : memref<2x2x608xf32, #tpu.memory_space<vmem>>, vector<2x2x352xf32>
      %186 = vector.broadcast %184 : vector<2x1x1xf32> to vector<2x2x352xf32>
      %187 = arith.mulf %186, %185 : vector<2x2x352xf32>
      %188 = arith.addf %179, %187 : vector<2x2x352xf32>
      %c17 = arith.constant 17 : index
      %189 = memref.load %arg2[%c17] : memref<98xf32, #tpu.memory_space<smem>>
      %c66 = arith.constant 66 : index
      %190 = memref.load %arg2[%c66] : memref<98xf32, #tpu.memory_space<smem>>
      %191 = vector.broadcast %189 : f32 to vector<2x1x1xf32>
      %192 = vector.broadcast %190 : f32 to vector<2x1x1xf32>
      %193 = arith.select %34, %191, %192 : vector<2x1x1xi1>, vector<2x1x1xf32>
      %c0_80 = arith.constant 0 : index
      %c0_81 = arith.constant 0 : index
      %c106 = arith.constant 106 : index
      %194 = vector.load %arg8[%c0_80, %c0_81, %c106] : memref<2x2x608xf32, #tpu.memory_space<vmem>>, vector<2x2x352xf32>
      %195 = vector.broadcast %193 : vector<2x1x1xf32> to vector<2x2x352xf32>
      %196 = arith.mulf %195, %194 : vector<2x2x352xf32>
      %197 = arith.addf %188, %196 : vector<2x2x352xf32>
      %c18 = arith.constant 18 : index
      %198 = memref.load %arg2[%c18] : memref<98xf32, #tpu.memory_space<smem>>
      %c67 = arith.constant 67 : index
      %199 = memref.load %arg2[%c67] : memref<98xf32, #tpu.memory_space<smem>>
      %200 = vector.broadcast %198 : f32 to vector<2x1x1xf32>
      %201 = vector.broadcast %199 : f32 to vector<2x1x1xf32>
      %202 = arith.select %34, %200, %201 : vector<2x1x1xi1>, vector<2x1x1xf32>
      %c0_82 = arith.constant 0 : index
      %c0_83 = arith.constant 0 : index
      %c107 = arith.constant 107 : index
      %203 = vector.load %arg8[%c0_82, %c0_83, %c107] : memref<2x2x608xf32, #tpu.memory_space<vmem>>, vector<2x2x352xf32>
      %204 = vector.broadcast %202 : vector<2x1x1xf32> to vector<2x2x352xf32>
      %205 = arith.mulf %204, %203 : vector<2x2x352xf32>
      %206 = arith.addf %197, %205 : vector<2x2x352xf32>
      %c19 = arith.constant 19 : index
      %207 = memref.load %arg2[%c19] : memref<98xf32, #tpu.memory_space<smem>>
      %c68 = arith.constant 68 : index
      %208 = memref.load %arg2[%c68] : memref<98xf32, #tpu.memory_space<smem>>
      %209 = vector.broadcast %207 : f32 to vector<2x1x1xf32>
      %210 = vector.broadcast %208 : f32 to vector<2x1x1xf32>
      %211 = arith.select %34, %209, %210 : vector<2x1x1xi1>, vector<2x1x1xf32>
      %c0_84 = arith.constant 0 : index
      %c0_85 = arith.constant 0 : index
      %c108 = arith.constant 108 : index
      %212 = vector.load %arg8[%c0_84, %c0_85, %c108] : memref<2x2x608xf32, #tpu.memory_space<vmem>>, vector<2x2x352xf32>
      %213 = vector.broadcast %211 : vector<2x1x1xf32> to vector<2x2x352xf32>
      %214 = arith.mulf %213, %212 : vector<2x2x352xf32>
      %215 = arith.addf %206, %214 : vector<2x2x352xf32>
      %c20 = arith.constant 20 : index
      %216 = memref.load %arg2[%c20] : memref<98xf32, #tpu.memory_space<smem>>
      %c69 = arith.constant 69 : index
      %217 = memref.load %arg2[%c69] : memref<98xf32, #tpu.memory_space<smem>>
      %218 = vector.broadcast %216 : f32 to vector<2x1x1xf32>
      %219 = vector.broadcast %217 : f32 to vector<2x1x1xf32>
      %220 = arith.select %34, %218, %219 : vector<2x1x1xi1>, vector<2x1x1xf32>
      %c0_86 = arith.constant 0 : index
      %c0_87 = arith.constant 0 : index
      %c109 = arith.constant 109 : index
      %221 = vector.load %arg8[%c0_86, %c0_87, %c109] : memref<2x2x608xf32, #tpu.memory_space<vmem>>, vector<2x2x352xf32>
      %222 = vector.broadcast %220 : vector<2x1x1xf32> to vector<2x2x352xf32>
      %223 = arith.mulf %222, %221 : vector<2x2x352xf32>
      %224 = arith.addf %215, %223 : vector<2x2x352xf32>
      %c21 = arith.constant 21 : index
      %225 = memref.load %arg2[%c21] : memref<98xf32, #tpu.memory_space<smem>>
      %c70 = arith.constant 70 : index
      %226 = memref.load %arg2[%c70] : memref<98xf32, #tpu.memory_space<smem>>
      %227 = vector.broadcast %225 : f32 to vector<2x1x1xf32>
      %228 = vector.broadcast %226 : f32 to vector<2x1x1xf32>
      %229 = arith.select %34, %227, %228 : vector<2x1x1xi1>, vector<2x1x1xf32>
      %c0_88 = arith.constant 0 : index
      %c0_89 = arith.constant 0 : index
      %c125 = arith.constant 125 : index
      %230 = vector.load %arg8[%c0_88, %c0_89, %c125] : memref<2x2x608xf32, #tpu.memory_space<vmem>>, vector<2x2x352xf32>
      %231 = vector.broadcast %229 : vector<2x1x1xf32> to vector<2x2x352xf32>
      %232 = arith.mulf %231, %230 : vector<2x2x352xf32>
      %233 = arith.addf %224, %232 : vector<2x2x352xf32>
      %c22 = arith.constant 22 : index
      %234 = memref.load %arg2[%c22] : memref<98xf32, #tpu.memory_space<smem>>
      %c71 = arith.constant 71 : index
      %235 = memref.load %arg2[%c71] : memref<98xf32, #tpu.memory_space<smem>>
      %236 = vector.broadcast %234 : f32 to vector<2x1x1xf32>
      %237 = vector.broadcast %235 : f32 to vector<2x1x1xf32>
      %238 = arith.select %34, %236, %237 : vector<2x1x1xi1>, vector<2x1x1xf32>
      %c0_90 = arith.constant 0 : index
      %c0_91 = arith.constant 0 : index
      %c126 = arith.constant 126 : index
      %239 = vector.load %arg8[%c0_90, %c0_91, %c126] : memref<2x2x608xf32, #tpu.memory_space<vmem>>, vector<2x2x352xf32>
      %240 = vector.broadcast %238 : vector<2x1x1xf32> to vector<2x2x352xf32>
      %241 = arith.mulf %240, %239 : vector<2x2x352xf32>
      %242 = arith.addf %233, %241 : vector<2x2x352xf32>
      %c23 = arith.constant 23 : index
      %243 = memref.load %arg2[%c23] : memref<98xf32, #tpu.memory_space<smem>>
      %c72 = arith.constant 72 : index
      %244 = memref.load %arg2[%c72] : memref<98xf32, #tpu.memory_space<smem>>
      %245 = vector.broadcast %243 : f32 to vector<2x1x1xf32>
      %246 = vector.broadcast %244 : f32 to vector<2x1x1xf32>
      %247 = arith.select %34, %245, %246 : vector<2x1x1xi1>, vector<2x1x1xf32>
      %c0_92 = arith.constant 0 : index
      %c0_93 = arith.constant 0 : index
      %c127 = arith.constant 127 : index
      %248 = vector.load %arg8[%c0_92, %c0_93, %c127] : memref<2x2x608xf32, #tpu.memory_space<vmem>>, vector<2x2x352xf32>
      %249 = vector.broadcast %247 : vector<2x1x1xf32> to vector<2x2x352xf32>
      %250 = arith.mulf %249, %248 : vector<2x2x352xf32>
      %251 = arith.addf %242, %250 : vector<2x2x352xf32>
      %c24 = arith.constant 24 : index
      %252 = memref.load %arg2[%c24] : memref<98xf32, #tpu.memory_space<smem>>
      %c73 = arith.constant 73 : index
      %253 = memref.load %arg2[%c73] : memref<98xf32, #tpu.memory_space<smem>>
      %254 = vector.broadcast %252 : f32 to vector<2x1x1xf32>
      %255 = vector.broadcast %253 : f32 to vector<2x1x1xf32>
      %256 = arith.select %34, %254, %255 : vector<2x1x1xi1>, vector<2x1x1xf32>
      %c0_94 = arith.constant 0 : index
      %c0_95 = arith.constant 0 : index
      %c128_96 = arith.constant 128 : index
      %257 = vector.load %arg8[%c0_94, %c0_95, %c128_96] : memref<2x2x608xf32, #tpu.memory_space<vmem>>, vector<2x2x352xf32>
      %258 = vector.broadcast %256 : vector<2x1x1xf32> to vector<2x2x352xf32>
      %259 = arith.mulf %258, %257 : vector<2x2x352xf32>
      %260 = arith.addf %251, %259 : vector<2x2x352xf32>
      %c25 = arith.constant 25 : index
      %261 = memref.load %arg2[%c25] : memref<98xf32, #tpu.memory_space<smem>>
      %c74 = arith.constant 74 : index
      %262 = memref.load %arg2[%c74] : memref<98xf32, #tpu.memory_space<smem>>
      %263 = vector.broadcast %261 : f32 to vector<2x1x1xf32>
      %264 = vector.broadcast %262 : f32 to vector<2x1x1xf32>
      %265 = arith.select %34, %263, %264 : vector<2x1x1xi1>, vector<2x1x1xf32>
      %c0_97 = arith.constant 0 : index
      %c0_98 = arith.constant 0 : index
      %c129 = arith.constant 129 : index
      %266 = vector.load %arg8[%c0_97, %c0_98, %c129] : memref<2x2x608xf32, #tpu.memory_space<vmem>>, vector<2x2x352xf32>
      %267 = vector.broadcast %265 : vector<2x1x1xf32> to vector<2x2x352xf32>
      %268 = arith.mulf %267, %266 : vector<2x2x352xf32>
      %269 = arith.addf %260, %268 : vector<2x2x352xf32>
      %c26 = arith.constant 26 : index
      %270 = memref.load %arg2[%c26] : memref<98xf32, #tpu.memory_space<smem>>
      %c75 = arith.constant 75 : index
      %271 = memref.load %arg2[%c75] : memref<98xf32, #tpu.memory_space<smem>>
      %272 = vector.broadcast %270 : f32 to vector<2x1x1xf32>
      %273 = vector.broadcast %271 : f32 to vector<2x1x1xf32>
      %274 = arith.select %34, %272, %273 : vector<2x1x1xi1>, vector<2x1x1xf32>
      %c0_99 = arith.constant 0 : index
      %c0_100 = arith.constant 0 : index
      %c130 = arith.constant 130 : index
      %275 = vector.load %arg8[%c0_99, %c0_100, %c130] : memref<2x2x608xf32, #tpu.memory_space<vmem>>, vector<2x2x352xf32>
      %276 = vector.broadcast %274 : vector<2x1x1xf32> to vector<2x2x352xf32>
      %277 = arith.mulf %276, %275 : vector<2x2x352xf32>
      %278 = arith.addf %269, %277 : vector<2x2x352xf32>
      %c27 = arith.constant 27 : index
      %279 = memref.load %arg2[%c27] : memref<98xf32, #tpu.memory_space<smem>>
      %c76 = arith.constant 76 : index
      %280 = memref.load %arg2[%c76] : memref<98xf32, #tpu.memory_space<smem>>
      %281 = vector.broadcast %279 : f32 to vector<2x1x1xf32>
      %282 = vector.broadcast %280 : f32 to vector<2x1x1xf32>
      %283 = arith.select %34, %281, %282 : vector<2x1x1xi1>, vector<2x1x1xf32>
      %c0_101 = arith.constant 0 : index
      %c0_102 = arith.constant 0 : index
      %c131 = arith.constant 131 : index
      %284 = vector.load %arg8[%c0_101, %c0_102, %c131] : memref<2x2x608xf32, #tpu.memory_space<vmem>>, vector<2x2x352xf32>
      %285 = vector.broadcast %283 : vector<2x1x1xf32> to vector<2x2x352xf32>
      %286 = arith.mulf %285, %284 : vector<2x2x352xf32>
      %287 = arith.addf %278, %286 : vector<2x2x352xf32>
      %c28 = arith.constant 28 : index
      %288 = memref.load %arg2[%c28] : memref<98xf32, #tpu.memory_space<smem>>
      %c77 = arith.constant 77 : index
      %289 = memref.load %arg2[%c77] : memref<98xf32, #tpu.memory_space<smem>>
      %290 = vector.broadcast %288 : f32 to vector<2x1x1xf32>
      %291 = vector.broadcast %289 : f32 to vector<2x1x1xf32>
      %292 = arith.select %34, %290, %291 : vector<2x1x1xi1>, vector<2x1x1xf32>
      %c0_103 = arith.constant 0 : index
      %c0_104 = arith.constant 0 : index
      %c147 = arith.constant 147 : index
      %293 = vector.load %arg8[%c0_103, %c0_104, %c147] : memref<2x2x608xf32, #tpu.memory_space<vmem>>, vector<2x2x352xf32>
      %294 = vector.broadcast %292 : vector<2x1x1xf32> to vector<2x2x352xf32>
      %295 = arith.mulf %294, %293 : vector<2x2x352xf32>
      %296 = arith.addf %287, %295 : vector<2x2x352xf32>
      %c29 = arith.constant 29 : index
      %297 = memref.load %arg2[%c29] : memref<98xf32, #tpu.memory_space<smem>>
      %c78 = arith.constant 78 : index
      %298 = memref.load %arg2[%c78] : memref<98xf32, #tpu.memory_space<smem>>
      %299 = vector.broadcast %297 : f32 to vector<2x1x1xf32>
      %300 = vector.broadcast %298 : f32 to vector<2x1x1xf32>
      %301 = arith.select %34, %299, %300 : vector<2x1x1xi1>, vector<2x1x1xf32>
      %c0_105 = arith.constant 0 : index
      %c0_106 = arith.constant 0 : index
      %c148 = arith.constant 148 : index
      %302 = vector.load %arg8[%c0_105, %c0_106, %c148] : memref<2x2x608xf32, #tpu.memory_space<vmem>>, vector<2x2x352xf32>
      %303 = vector.broadcast %301 : vector<2x1x1xf32> to vector<2x2x352xf32>
      %304 = arith.mulf %303, %302 : vector<2x2x352xf32>
      %305 = arith.addf %296, %304 : vector<2x2x352xf32>
      %c30 = arith.constant 30 : index
      %306 = memref.load %arg2[%c30] : memref<98xf32, #tpu.memory_space<smem>>
      %c79 = arith.constant 79 : index
      %307 = memref.load %arg2[%c79] : memref<98xf32, #tpu.memory_space<smem>>
      %308 = vector.broadcast %306 : f32 to vector<2x1x1xf32>
      %309 = vector.broadcast %307 : f32 to vector<2x1x1xf32>
      %310 = arith.select %34, %308, %309 : vector<2x1x1xi1>, vector<2x1x1xf32>
      %c0_107 = arith.constant 0 : index
      %c0_108 = arith.constant 0 : index
      %c149 = arith.constant 149 : index
      %311 = vector.load %arg8[%c0_107, %c0_108, %c149] : memref<2x2x608xf32, #tpu.memory_space<vmem>>, vector<2x2x352xf32>
      %312 = vector.broadcast %310 : vector<2x1x1xf32> to vector<2x2x352xf32>
      %313 = arith.mulf %312, %311 : vector<2x2x352xf32>
      %314 = arith.addf %305, %313 : vector<2x2x352xf32>
      %c31 = arith.constant 31 : index
      %315 = memref.load %arg2[%c31] : memref<98xf32, #tpu.memory_space<smem>>
      %c80 = arith.constant 80 : index
      %316 = memref.load %arg2[%c80] : memref<98xf32, #tpu.memory_space<smem>>
      %317 = vector.broadcast %315 : f32 to vector<2x1x1xf32>
      %318 = vector.broadcast %316 : f32 to vector<2x1x1xf32>
      %319 = arith.select %34, %317, %318 : vector<2x1x1xi1>, vector<2x1x1xf32>
      %c0_109 = arith.constant 0 : index
      %c0_110 = arith.constant 0 : index
      %c150 = arith.constant 150 : index
      %320 = vector.load %arg8[%c0_109, %c0_110, %c150] : memref<2x2x608xf32, #tpu.memory_space<vmem>>, vector<2x2x352xf32>
      %321 = vector.broadcast %319 : vector<2x1x1xf32> to vector<2x2x352xf32>
      %322 = arith.mulf %321, %320 : vector<2x2x352xf32>
      %323 = arith.addf %314, %322 : vector<2x2x352xf32>
      %c32 = arith.constant 32 : index
      %324 = memref.load %arg2[%c32] : memref<98xf32, #tpu.memory_space<smem>>
      %c81_111 = arith.constant 81 : index
      %325 = memref.load %arg2[%c81_111] : memref<98xf32, #tpu.memory_space<smem>>
      %326 = vector.broadcast %324 : f32 to vector<2x1x1xf32>
      %327 = vector.broadcast %325 : f32 to vector<2x1x1xf32>
      %328 = arith.select %34, %326, %327 : vector<2x1x1xi1>, vector<2x1x1xf32>
      %c0_112 = arith.constant 0 : index
      %c0_113 = arith.constant 0 : index
      %c151 = arith.constant 151 : index
      %329 = vector.load %arg8[%c0_112, %c0_113, %c151] : memref<2x2x608xf32, #tpu.memory_space<vmem>>, vector<2x2x352xf32>
      %330 = vector.broadcast %328 : vector<2x1x1xf32> to vector<2x2x352xf32>
      %331 = arith.mulf %330, %329 : vector<2x2x352xf32>
      %332 = arith.addf %323, %331 : vector<2x2x352xf32>
      %c33 = arith.constant 33 : index
      %333 = memref.load %arg2[%c33] : memref<98xf32, #tpu.memory_space<smem>>
      %c82_114 = arith.constant 82 : index
      %334 = memref.load %arg2[%c82_114] : memref<98xf32, #tpu.memory_space<smem>>
      %335 = vector.broadcast %333 : f32 to vector<2x1x1xf32>
      %336 = vector.broadcast %334 : f32 to vector<2x1x1xf32>
      %337 = arith.select %34, %335, %336 : vector<2x1x1xi1>, vector<2x1x1xf32>
      %c0_115 = arith.constant 0 : index
      %c0_116 = arith.constant 0 : index
      %c152 = arith.constant 152 : index
      %338 = vector.load %arg8[%c0_115, %c0_116, %c152] : memref<2x2x608xf32, #tpu.memory_space<vmem>>, vector<2x2x352xf32>
      %339 = vector.broadcast %337 : vector<2x1x1xf32> to vector<2x2x352xf32>
      %340 = arith.mulf %339, %338 : vector<2x2x352xf32>
      %341 = arith.addf %332, %340 : vector<2x2x352xf32>
      %c34 = arith.constant 34 : index
      %342 = memref.load %arg2[%c34] : memref<98xf32, #tpu.memory_space<smem>>
      %c83_117 = arith.constant 83 : index
      %343 = memref.load %arg2[%c83_117] : memref<98xf32, #tpu.memory_space<smem>>
      %344 = vector.broadcast %342 : f32 to vector<2x1x1xf32>
      %345 = vector.broadcast %343 : f32 to vector<2x1x1xf32>
      %346 = arith.select %34, %344, %345 : vector<2x1x1xi1>, vector<2x1x1xf32>
      %c0_118 = arith.constant 0 : index
      %c0_119 = arith.constant 0 : index
      %c153 = arith.constant 153 : index
      %347 = vector.load %arg8[%c0_118, %c0_119, %c153] : memref<2x2x608xf32, #tpu.memory_space<vmem>>, vector<2x2x352xf32>
      %348 = vector.broadcast %346 : vector<2x1x1xf32> to vector<2x2x352xf32>
      %349 = arith.mulf %348, %347 : vector<2x2x352xf32>
      %350 = arith.addf %341, %349 : vector<2x2x352xf32>
      %c35 = arith.constant 35 : index
      %351 = memref.load %arg2[%c35] : memref<98xf32, #tpu.memory_space<smem>>
      %c84_120 = arith.constant 84 : index
      %352 = memref.load %arg2[%c84_120] : memref<98xf32, #tpu.memory_space<smem>>
      %353 = vector.broadcast %351 : f32 to vector<2x1x1xf32>
      %354 = vector.broadcast %352 : f32 to vector<2x1x1xf32>
      %355 = arith.select %34, %353, %354 : vector<2x1x1xi1>, vector<2x1x1xf32>
      %c0_121 = arith.constant 0 : index
      %c0_122 = arith.constant 0 : index
      %c169 = arith.constant 169 : index
      %356 = vector.load %arg8[%c0_121, %c0_122, %c169] : memref<2x2x608xf32, #tpu.memory_space<vmem>>, vector<2x2x352xf32>
      %357 = vector.broadcast %355 : vector<2x1x1xf32> to vector<2x2x352xf32>
      %358 = arith.mulf %357, %356 : vector<2x2x352xf32>
      %359 = arith.addf %350, %358 : vector<2x2x352xf32>
      %c36 = arith.constant 36 : index
      %360 = memref.load %arg2[%c36] : memref<98xf32, #tpu.memory_space<smem>>
      %c85_123 = arith.constant 85 : index
      %361 = memref.load %arg2[%c85_123] : memref<98xf32, #tpu.memory_space<smem>>
      %362 = vector.broadcast %360 : f32 to vector<2x1x1xf32>
      %363 = vector.broadcast %361 : f32 to vector<2x1x1xf32>
      %364 = arith.select %34, %362, %363 : vector<2x1x1xi1>, vector<2x1x1xf32>
      %c0_124 = arith.constant 0 : index
      %c0_125 = arith.constant 0 : index
      %c170 = arith.constant 170 : index
      %365 = vector.load %arg8[%c0_124, %c0_125, %c170] : memref<2x2x608xf32, #tpu.memory_space<vmem>>, vector<2x2x352xf32>
      %366 = vector.broadcast %364 : vector<2x1x1xf32> to vector<2x2x352xf32>
      %367 = arith.mulf %366, %365 : vector<2x2x352xf32>
      %368 = arith.addf %359, %367 : vector<2x2x352xf32>
      %c37 = arith.constant 37 : index
      %369 = memref.load %arg2[%c37] : memref<98xf32, #tpu.memory_space<smem>>
      %c86_126 = arith.constant 86 : index
      %370 = memref.load %arg2[%c86_126] : memref<98xf32, #tpu.memory_space<smem>>
      %371 = vector.broadcast %369 : f32 to vector<2x1x1xf32>
      %372 = vector.broadcast %370 : f32 to vector<2x1x1xf32>
      %373 = arith.select %34, %371, %372 : vector<2x1x1xi1>, vector<2x1x1xf32>
      %c0_127 = arith.constant 0 : index
      %c0_128 = arith.constant 0 : index
      %c171 = arith.constant 171 : index
      %374 = vector.load %arg8[%c0_127, %c0_128, %c171] : memref<2x2x608xf32, #tpu.memory_space<vmem>>, vector<2x2x352xf32>
      %375 = vector.broadcast %373 : vector<2x1x1xf32> to vector<2x2x352xf32>
      %376 = arith.mulf %375, %374 : vector<2x2x352xf32>
      %377 = arith.addf %368, %376 : vector<2x2x352xf32>
      %c38 = arith.constant 38 : index
      %378 = memref.load %arg2[%c38] : memref<98xf32, #tpu.memory_space<smem>>
      %c87_129 = arith.constant 87 : index
      %379 = memref.load %arg2[%c87_129] : memref<98xf32, #tpu.memory_space<smem>>
      %380 = vector.broadcast %378 : f32 to vector<2x1x1xf32>
      %381 = vector.broadcast %379 : f32 to vector<2x1x1xf32>
      %382 = arith.select %34, %380, %381 : vector<2x1x1xi1>, vector<2x1x1xf32>
      %c0_130 = arith.constant 0 : index
      %c0_131 = arith.constant 0 : index
      %c172 = arith.constant 172 : index
      %383 = vector.load %arg8[%c0_130, %c0_131, %c172] : memref<2x2x608xf32, #tpu.memory_space<vmem>>, vector<2x2x352xf32>
      %384 = vector.broadcast %382 : vector<2x1x1xf32> to vector<2x2x352xf32>
      %385 = arith.mulf %384, %383 : vector<2x2x352xf32>
      %386 = arith.addf %377, %385 : vector<2x2x352xf32>
      %c39 = arith.constant 39 : index
      %387 = memref.load %arg2[%c39] : memref<98xf32, #tpu.memory_space<smem>>
      %c88 = arith.constant 88 : index
      %388 = memref.load %arg2[%c88] : memref<98xf32, #tpu.memory_space<smem>>
      %389 = vector.broadcast %387 : f32 to vector<2x1x1xf32>
      %390 = vector.broadcast %388 : f32 to vector<2x1x1xf32>
      %391 = arith.select %34, %389, %390 : vector<2x1x1xi1>, vector<2x1x1xf32>
      %c0_132 = arith.constant 0 : index
      %c0_133 = arith.constant 0 : index
      %c173 = arith.constant 173 : index
      %392 = vector.load %arg8[%c0_132, %c0_133, %c173] : memref<2x2x608xf32, #tpu.memory_space<vmem>>, vector<2x2x352xf32>
      %393 = vector.broadcast %391 : vector<2x1x1xf32> to vector<2x2x352xf32>
      %394 = arith.mulf %393, %392 : vector<2x2x352xf32>
      %395 = arith.addf %386, %394 : vector<2x2x352xf32>
      %c40 = arith.constant 40 : index
      %396 = memref.load %arg2[%c40] : memref<98xf32, #tpu.memory_space<smem>>
      %c89 = arith.constant 89 : index
      %397 = memref.load %arg2[%c89] : memref<98xf32, #tpu.memory_space<smem>>
      %398 = vector.broadcast %396 : f32 to vector<2x1x1xf32>
      %399 = vector.broadcast %397 : f32 to vector<2x1x1xf32>
      %400 = arith.select %34, %398, %399 : vector<2x1x1xi1>, vector<2x1x1xf32>
      %c0_134 = arith.constant 0 : index
      %c0_135 = arith.constant 0 : index
      %c174 = arith.constant 174 : index
      %401 = vector.load %arg8[%c0_134, %c0_135, %c174] : memref<2x2x608xf32, #tpu.memory_space<vmem>>, vector<2x2x352xf32>
      %402 = vector.broadcast %400 : vector<2x1x1xf32> to vector<2x2x352xf32>
      %403 = arith.mulf %402, %401 : vector<2x2x352xf32>
      %404 = arith.addf %395, %403 : vector<2x2x352xf32>
      %c41 = arith.constant 41 : index
      %405 = memref.load %arg2[%c41] : memref<98xf32, #tpu.memory_space<smem>>
      %c90 = arith.constant 90 : index
      %406 = memref.load %arg2[%c90] : memref<98xf32, #tpu.memory_space<smem>>
      %407 = vector.broadcast %405 : f32 to vector<2x1x1xf32>
      %408 = vector.broadcast %406 : f32 to vector<2x1x1xf32>
      %409 = arith.select %34, %407, %408 : vector<2x1x1xi1>, vector<2x1x1xf32>
      %c0_136 = arith.constant 0 : index
      %c0_137 = arith.constant 0 : index
      %c175 = arith.constant 175 : index
      %410 = vector.load %arg8[%c0_136, %c0_137, %c175] : memref<2x2x608xf32, #tpu.memory_space<vmem>>, vector<2x2x352xf32>
      %411 = vector.broadcast %409 : vector<2x1x1xf32> to vector<2x2x352xf32>
      %412 = arith.mulf %411, %410 : vector<2x2x352xf32>
      %413 = arith.addf %404, %412 : vector<2x2x352xf32>
      %c42 = arith.constant 42 : index
      %414 = memref.load %arg2[%c42] : memref<98xf32, #tpu.memory_space<smem>>
      %c91 = arith.constant 91 : index
      %415 = memref.load %arg2[%c91] : memref<98xf32, #tpu.memory_space<smem>>
      %416 = vector.broadcast %414 : f32 to vector<2x1x1xf32>
      %417 = vector.broadcast %415 : f32 to vector<2x1x1xf32>
      %418 = arith.select %34, %416, %417 : vector<2x1x1xi1>, vector<2x1x1xf32>
      %c0_138 = arith.constant 0 : index
      %c0_139 = arith.constant 0 : index
      %c191 = arith.constant 191 : index
      %419 = vector.load %arg8[%c0_138, %c0_139, %c191] : memref<2x2x608xf32, #tpu.memory_space<vmem>>, vector<2x2x352xf32>
      %420 = vector.broadcast %418 : vector<2x1x1xf32> to vector<2x2x352xf32>
      %421 = arith.mulf %420, %419 : vector<2x2x352xf32>
      %422 = arith.addf %413, %421 : vector<2x2x352xf32>
      %c43 = arith.constant 43 : index
      %423 = memref.load %arg2[%c43] : memref<98xf32, #tpu.memory_space<smem>>
      %c92 = arith.constant 92 : index
      %424 = memref.load %arg2[%c92] : memref<98xf32, #tpu.memory_space<smem>>
      %425 = vector.broadcast %423 : f32 to vector<2x1x1xf32>
      %426 = vector.broadcast %424 : f32 to vector<2x1x1xf32>
      %427 = arith.select %34, %425, %426 : vector<2x1x1xi1>, vector<2x1x1xf32>
      %c0_140 = arith.constant 0 : index
      %c0_141 = arith.constant 0 : index
      %c192 = arith.constant 192 : index
      %428 = vector.load %arg8[%c0_140, %c0_141, %c192] : memref<2x2x608xf32, #tpu.memory_space<vmem>>, vector<2x2x352xf32>
      %429 = vector.broadcast %427 : vector<2x1x1xf32> to vector<2x2x352xf32>
      %430 = arith.mulf %429, %428 : vector<2x2x352xf32>
      %431 = arith.addf %422, %430 : vector<2x2x352xf32>
      %c44 = arith.constant 44 : index
      %432 = memref.load %arg2[%c44] : memref<98xf32, #tpu.memory_space<smem>>
      %c93 = arith.constant 93 : index
      %433 = memref.load %arg2[%c93] : memref<98xf32, #tpu.memory_space<smem>>
      %434 = vector.broadcast %432 : f32 to vector<2x1x1xf32>
      %435 = vector.broadcast %433 : f32 to vector<2x1x1xf32>
      %436 = arith.select %34, %434, %435 : vector<2x1x1xi1>, vector<2x1x1xf32>
      %c0_142 = arith.constant 0 : index
      %c0_143 = arith.constant 0 : index
      %c193 = arith.constant 193 : index
      %437 = vector.load %arg8[%c0_142, %c0_143, %c193] : memref<2x2x608xf32, #tpu.memory_space<vmem>>, vector<2x2x352xf32>
      %438 = vector.broadcast %436 : vector<2x1x1xf32> to vector<2x2x352xf32>
      %439 = arith.mulf %438, %437 : vector<2x2x352xf32>
      %440 = arith.addf %431, %439 : vector<2x2x352xf32>
      %c45 = arith.constant 45 : index
      %441 = memref.load %arg2[%c45] : memref<98xf32, #tpu.memory_space<smem>>
      %c94 = arith.constant 94 : index
      %442 = memref.load %arg2[%c94] : memref<98xf32, #tpu.memory_space<smem>>
      %443 = vector.broadcast %441 : f32 to vector<2x1x1xf32>
      %444 = vector.broadcast %442 : f32 to vector<2x1x1xf32>
      %445 = arith.select %34, %443, %444 : vector<2x1x1xi1>, vector<2x1x1xf32>
      %c0_144 = arith.constant 0 : index
      %c0_145 = arith.constant 0 : index
      %c194 = arith.constant 194 : index
      %446 = vector.load %arg8[%c0_144, %c0_145, %c194] : memref<2x2x608xf32, #tpu.memory_space<vmem>>, vector<2x2x352xf32>
      %447 = vector.broadcast %445 : vector<2x1x1xf32> to vector<2x2x352xf32>
      %448 = arith.mulf %447, %446 : vector<2x2x352xf32>
      %449 = arith.addf %440, %448 : vector<2x2x352xf32>
      %c46 = arith.constant 46 : index
      %450 = memref.load %arg2[%c46] : memref<98xf32, #tpu.memory_space<smem>>
      %c95 = arith.constant 95 : index
      %451 = memref.load %arg2[%c95] : memref<98xf32, #tpu.memory_space<smem>>
      %452 = vector.broadcast %450 : f32 to vector<2x1x1xf32>
      %453 = vector.broadcast %451 : f32 to vector<2x1x1xf32>
      %454 = arith.select %34, %452, %453 : vector<2x1x1xi1>, vector<2x1x1xf32>
      %c0_146 = arith.constant 0 : index
      %c0_147 = arith.constant 0 : index
      %c195 = arith.constant 195 : index
      %455 = vector.load %arg8[%c0_146, %c0_147, %c195] : memref<2x2x608xf32, #tpu.memory_space<vmem>>, vector<2x2x352xf32>
      %456 = vector.broadcast %454 : vector<2x1x1xf32> to vector<2x2x352xf32>
      %457 = arith.mulf %456, %455 : vector<2x2x352xf32>
      %458 = arith.addf %449, %457 : vector<2x2x352xf32>
      %c47 = arith.constant 47 : index
      %459 = memref.load %arg2[%c47] : memref<98xf32, #tpu.memory_space<smem>>
      %c96 = arith.constant 96 : index
      %460 = memref.load %arg2[%c96] : memref<98xf32, #tpu.memory_space<smem>>
      %461 = vector.broadcast %459 : f32 to vector<2x1x1xf32>
      %462 = vector.broadcast %460 : f32 to vector<2x1x1xf32>
      %463 = arith.select %34, %461, %462 : vector<2x1x1xi1>, vector<2x1x1xf32>
      %c0_148 = arith.constant 0 : index
      %c0_149 = arith.constant 0 : index
      %c196 = arith.constant 196 : index
      %464 = vector.load %arg8[%c0_148, %c0_149, %c196] : memref<2x2x608xf32, #tpu.memory_space<vmem>>, vector<2x2x352xf32>
      %465 = vector.broadcast %463 : vector<2x1x1xf32> to vector<2x2x352xf32>
      %466 = arith.mulf %465, %464 : vector<2x2x352xf32>
      %467 = arith.addf %458, %466 : vector<2x2x352xf32>
      %c48 = arith.constant 48 : index
      %468 = memref.load %arg2[%c48] : memref<98xf32, #tpu.memory_space<smem>>
      %c97 = arith.constant 97 : index
      %469 = memref.load %arg2[%c97] : memref<98xf32, #tpu.memory_space<smem>>
      %470 = vector.broadcast %468 : f32 to vector<2x1x1xf32>
      %471 = vector.broadcast %469 : f32 to vector<2x1x1xf32>
      %472 = arith.select %34, %470, %471 : vector<2x1x1xi1>, vector<2x1x1xf32>
      %c0_150 = arith.constant 0 : index
      %c0_151 = arith.constant 0 : index
      %c197 = arith.constant 197 : index
      %473 = vector.load %arg8[%c0_150, %c0_151, %c197] : memref<2x2x608xf32, #tpu.memory_space<vmem>>, vector<2x2x352xf32>
      %474 = vector.broadcast %472 : vector<2x1x1xf32> to vector<2x2x352xf32>
      %475 = arith.mulf %474, %473 : vector<2x2x352xf32>
      %476 = arith.addf %467, %475 : vector<2x2x352xf32>
      %477 = vector.extract_strided_slice %476 {offsets = [0, 0, 0], sizes = [1, 2, 352], strides = [1, 1, 1]} : vector<2x2x352xf32> to vector<1x2x352xf32>
      %478 = vector.shape_cast %477 : vector<1x2x352xf32> to vector<2x352xf32>
      %479 = vector.extract_strided_slice %476 {offsets = [1, 0, 0], sizes = [1, 2, 352], strides = [1, 1, 1]} : vector<2x2x352xf32> to vector<1x2x352xf32>
      %480 = vector.shape_cast %479 : vector<1x2x352xf32> to vector<2x352xf32>
      %481 = arith.addf %478, %480 : vector<2x352xf32>
      %c0_152 = arith.constant 0 : index
      %482 = memref.load %arg3[%c0_152] : memref<1xf32, #tpu.memory_space<smem>>
      %483 = vector.broadcast %482 : f32 to vector<2x352xf32>
      %484 = arith.addf %481, %483 : vector<2x352xf32>
      %485 = arith.negf %484 : vector<2x352xf32>
      %486 = math.exp %485 : vector<2x352xf32>
      %cst_153 = arith.constant 1.000000e+00 : f32
      %487 = vector.broadcast %cst_153 : f32 to vector<2x352xf32>
      %488 = arith.addf %487, %486 : vector<2x352xf32>
      %489 = arith.divf %487, %488 : vector<2x352xf32>
      %c0_154 = arith.constant 0 : index
      %c0_155 = arith.constant 0 : index
      %c0_156 = arith.constant 0 : index
      %490 = vector.load %arg5[%c0_154, %c0_155, %c0_156] : memref<2x1x352xf32, #tpu.memory_space<vmem>>, vector<2x1x352xf32>
      %491 = vector.shape_cast %490 : vector<2x1x352xf32> to vector<2x352xf32>
      %492 = vector.shape_cast %489 : vector<2x352xf32> to vector<2x1x352xf32>
      tpu.vector_store %arg5[%c0_154, %c0_155, %c0_156], %492 {strides = array<i32>} : memref<2x1x352xf32, #tpu.memory_space<vmem>>, vector<2x1x352xf32>,
    } else {
    }
    return
  }
  func.func @transform_0(%arg0: i32, %arg1: i32) -> i32 {
    %c0_i32 = arith.constant 0 : i32
    %c0_i32_0 = arith.constant 0 : i32
    return %c0_i32 : i32
  }
  func.func @transform_1(%arg0: i32, %arg1: i32) -> i32 {
    %c0_i32 = arith.constant 0 : i32
    %c0_i32_0 = arith.constant 0 : i32
    return %c0_i32 : i32
  }
  func.func @transform_2(%arg0: i32, %arg1: i32) -> (i32, i32, i32) {
    %c0_i32 = arith.constant 0 : i32
    %c0_i32_0 = arith.constant 0 : i32
    return %arg0, %arg1, %c0_i32 : i32, i32, i32
  }
  func.func @transform_3(%arg0: i32, %arg1: i32) -> (i32, i32, i32) {
    %c0_i32 = arith.constant 0 : i32
    %c0_i32_0 = arith.constant 0 : i32
    %c0_i32_1 = arith.constant 0 : i32
    return %arg0, %c0_i32, %c0_i32_0 : i32, i32, i32
  }
}

</mosaic_0001>

<bundles_post_ra>
// kernel: tpu_custom_call.1
= control target key start
LH: loop header
LB: loop body
LE: loop exit
PB: predicated region body
PF: predicated region fallthrough
CT: control target
= control target key end

     0   :  { %9 = vsyncpa [#allocation9], 0  ;;  %s2238_s0 = inlined_call_operand.vmem [shape: f32[98], index: 0, kind: input, shape index: {}]   ;;  %s2239_s1 = inlined_call_operand.<no memory space> [shape: f32[1], index: 1, kind: input, shape index: {}]   ;;  %s2240_s2 = inlined_call_operand.hbm [shape: f32[2,4,352], index: 2, kind: input, shape index: {}]   ;;  %s2241_s3 = inlined_call_operand.hbm [shape: f32[2,1,352], index: 3, kind: output, shape index: {}]  }
   0x1   :  { %10 = vsyncpa [#allocation7], 0 }
   0x2   :  { %11 = vsyncpa [#allocation8], 0  ;;  %s17_s14 = sshll.u32 %s2238_s0, 4  ;;  %s27_s17 = sshll.u32 %s2240_s2, 4  ;;  %s18_s14 = int_to_ptr.vmem [resolvable:$true] %s17_s14  ;;  %s28_s17 = int_to_ptr.hbm [resolvable:$true] %s27_s17 }
   0x3   :  { %s1588_s18 = smov [#allocation6]   ;;  %s1589_s19 = smov [#allocation10]  }
   0x4   :  { %20 = dma.vmem_to_smem %s18_s14, 16, %s1588_s18, [#allocation9]  }
   0x5   :  { %s29_s20 = sshll.u32 %s1589_s19, 4  ;;  %s1590_s21 = smov 192   ;;  %s30_s20 = int_to_ptr.vmem [resolvable:$true] %s29_s20 }
   0x6   :  { %s1591_s22 = smov 12  }
   0x7   :  { %35 = dma.hbm_to_vmem [thread:$0]  %s28_s17, 384, %s30_s20, [#allocation7], %s1590_s21, %s1590_s21, %s1591_s22  }
   0x8   :  { %1582 = dma.done.wait [#allocation9], 16  }
   0x9   :  { %1583 = vsyncadd [#allocation9], 4294967280 }
   0xa   :  { %1584 = dma.done.wait [#allocation7], 384  }
   0xb   :  { %1585 = vsyncadd [#allocation7], 4294966912 }
   0xc   :  { %44 = sfence }
   0xd   :  { %v49_v0 = vlaneseq  ;;  %v57_v1 = vld [vmem:[#allocation10] sm:$0xff]  ;;  %v58_v2 = vld [vmem:[#allocation10 + $0x8] sm:$0xf]  ;;  %v1592_v4 = vmov 0.0   ;;  %v59_v5 = vld [vmem:[#allocation10 + $0xc] sm:$0xff]  ;;  %v1593_v6 = vmov -inf  }
   0xe   :  { %67 = vst [vmem:[#allocation1] ss:$2 sm:$0xff] %v57_v1  ;;  %v60_v7 = vld [vmem:[#allocation10 + $0x14] sm:$0xf]  ;;  %vm86_vm1 = vcmask 1043456   ;;  %vm101_vm2 = vcmask 781312  }
   0xf   :  { %vm1669_vm0 = vcmp.lt.s32.totalorder %v49_v0, 352  ;;  %69 = vst [vmem:[#allocation1 + $0x10] ss:$2 sm:$0xff] %v58_v2  ;;  %vm140_vm3 = vcmask 1040384   ;;  %vm2242_vm4 = vcmask 1041408   ;;  %vm250_vm5 = vcmask 1042176  }
  0x10   :  { %53 = vst.msk [vmem:[#allocation2] sm:$0x7] %vm1669_vm0, %v1592_v4  ;;  %vm251_vm6 = vcmask 781314   ;;  %vm262_vm8 = vcmask 1043458   ;;  %vm264_vm10 = vcmask 783364   ;;  %s1369_s0 = sld [smem:[#allocation6 + $0x2]] }
  0x11   :  { %54 = vst.msk [vmem:[#allocation2 + $0x3] sm:$0x7] %vm1669_vm0, %v1592_v4  ;;  %vm252_vm7 = vmor %vm251_vm6, %vm250_vm5  ;;  %s1367_s2 = sld [smem:[#allocation6 + $0x1]]  ;;  %s1594_s27 = smov 126   ;;  %vm300_vm12 = vcmask 1039360   ;;  %vm321_vm13 = vcmask 1031168  }
  0x12   :  { %55 = vst.msk [vmem:[#allocation3] sm:$0x7] %vm1669_vm0, %v1593_v6  ;;  %vm263_vm9 = vmor %vm262_vm8, %vm2242_vm4  ;;  %s1371_s23 = sld [smem:[#allocation6 + $0x3]]  ;;  %s1595_s28 = smov 127   ;;  %vm342_vm14 = vcmask 1022976   ;;  %vm363_vm15 = vcmask 1014784  }
  0x13   :  { %56 = vst.msk [vmem:[#allocation3 + $0x3] sm:$0x7] %vm1669_vm0, %v1593_v6  ;;  %vm1716_vm11 = vmor %vm264_vm10, %vm263_vm9  ;;  %s1377_s24 = sld [smem:[#allocation6 + $0x6]]  ;;  %s1596_s4 = smov 125   ;;  %vm426_vm5 = vcmask 867328   ;;  %vm447_vm6 = vcmask 859136  }
  0x14   :  { %74 = vst [vmem:[#allocation1 + $0x20] ss:$2 sm:$0xff] %v59_v5  ;;  %s1373_s25 = sld [smem:[#allocation6 + $0x4]]  ;;  %s1597_s6 = smov 122   ;;  %vm489_vm8 = vcmask 842752   ;;  %vm510_vm9 = vcmask 834560  }
  0x15   :  { %v70_v8 = vld.sshfl [vmem:[#allocation1] sm:$0xff pattern:$0x75316420]  ;;  %v71_v9 = vld.sshfl [vmem:[#allocation1 + $0x8] sm:$0xff pattern:$0x75316420] }
  0x16   :  { %v72_v10 = vld.sshfl [vmem:[#allocation1 + $0x10] sm:$0xff pattern:$0x75316420]  ;;  %76 = vst [vmem:[#allocation1 + $0x30] ss:$2 sm:$0xff] %v60_v7  ;;  %v87_v11 = vsel %vm86_vm1, %v70_v8, 0.0 }
  0x17   :  { %v88_v12 = vrot.slane %v87_v11, 4  ;;  %v94_v13 = vsel %vm86_vm1, %v71_v9, 0.0  ;;  %v102_v14 = vsel %vm101_vm2, %v72_v10, 0.0  ;;  %158 = vst [vmem:[#allocation1] ss:$2 sm:$0xff] %v57_v1  ;;  %s1375_s26 = sld [smem:[#allocation6 + $0x5]] }
  0x18   :  { %v95_v15 = vrot.slane %v94_v13, 4  ;;  %v103_v16 = vrot.slane %v102_v14, 4  ;;  %160 = vst [vmem:[#allocation1 + $0x10] ss:$2 sm:$0xff] %v58_v2  ;;  %v61_v47 = vld [vmem:[#allocation2] sm:$0x7] }
  0x19   :  { %v89_v17 = vadd.f32 %v88_v12, %v87_v11  ;;  %248 = vst [vmem:[#allocation4] sm:$0x3] %v1592_v4  ;;  %s1383_s29 = sld [smem:[#allocation6 + $0x9]]  ;;  %s1598_s7 = smov 124   ;;  %vm531_vm10 = vcmask 826368  }
  0x1a   :  { %v96_v18 = vadd.f32 %v95_v15, %v94_v13  ;;  %v104_v19 = vadd.f32 %v103_v16, %v102_v14  ;;  %249 = vst [vmem:[#allocation4 + $0xa] sm:$0x3] %v1592_v4  ;;  %s1379_s30 = sld [smem:[#allocation6 + $0x7]]  ;;  %s1599_s10 = smov 123  }
  0x1b   :  { %v77_v20 = vld.sshfl [vmem:[#allocation1 + $0x20] sm:$0xff pattern:$0x75316420]  ;;  %v78_v21 = vld.sshfl [vmem:[#allocation1 + $0x28] sm:$0xff pattern:$0x75316420] }
  0x1c   :  { %v90_v22 = vrot.slane %v89_v17, 2  ;;  %v97_v23 = vrot.slane %v96_v18, 2  ;;  %v105_v24 = vrot.slane %v104_v19, 2  ;;  %v109_v25 = vsel %vm86_vm1, %v77_v20, 0.0  ;;  %165 = vst [vmem:[#allocation1 + $0x20] ss:$2 sm:$0xff] %v59_v5 }
  0x1d   :  { %v79_v26 = vld.sshfl [vmem:[#allocation1 + $0x30] sm:$0xff pattern:$0x75316420]  ;;  %v110_v27 = vrot.slane %v109_v25, 4  ;;  %v116_v28 = vsel %vm86_vm1, %v78_v21, 0.0  ;;  %s1381_s5 = sld [smem:[#allocation6 + $0x8]] }
  0x1e   :  { %v91_v29 = vadd.f32 %v90_v22, %v89_v17  ;;  %v98_v30 = vadd.f32 %v97_v23, %v96_v18  ;;  %v106_v31 = vadd.f32 %v105_v24, %v104_v19  ;;  %v117_v32 = vrot.slane %v116_v28, 4  ;;  %167 = vst [vmem:[#allocation1 + $0x30] ss:$2 sm:$0xff] %v60_v7  ;;  %v161_v39 = vld.sshfl [vmem:[#allocation1] sm:$0xff pattern:$0x75316420] }
  0x1f   :  { %v111_v33 = vadd.f32 %v110_v27, %v109_v25  ;;  %v123_v34 = vsel %vm101_vm2, %v79_v26, 0.0  ;;  %v177_v42 = vsel %vm86_vm1, %v161_v39, -inf  ;;  %v162_v50 = vld.sshfl [vmem:[#allocation1 + $0x8] sm:$0xff pattern:$0x75316420]  ;;  %s1389_s8 = sld [smem:[#allocation6 + $0xc]] }
  0x20   :  { %v92_v35 = vrot.slane %v91_v29, 1  ;;  %v99_v36 = vrot.slane %v98_v30, 1  ;;  %v107_v37 = vrot.slane %v106_v31, 1  ;;  %v118_v38 = vadd.f32 %v117_v32, %v116_v28  ;;  %v163_v54 = vld.sshfl [vmem:[#allocation1 + $0x10] sm:$0xff pattern:$0x75316420] }
  0x21   :  { %v112_v40 = vrot.slane %v111_v33, 2  ;;  %v124_v41 = vrot.slane %v123_v34, 4  ;;  %v178_v55 = vrot.slane %v177_v42, 4  ;;  %v184_v59 = vsel %vm86_vm1, %v162_v50, -inf  ;;  %v62_v28 = vld [vmem:[#allocation2 + $0x3] sm:$0x7] }
  0x22   :  { %v93_v43 = vadd.f32 %v92_v35, %v91_v29  ;;  %v100_v44 = vadd.f32 %v99_v36, %v98_v30  ;;  %v108_v45 = vadd.f32 %v107_v37, %v106_v31  ;;  %v119_v46 = vrot.slane %v118_v38, 2  ;;  %253 = vst.msk [vmem:[#allocation4 + $0x6] sm:$0xf] %vm252_vm7, %v1592_v4  ;;  %s1385_s9 = sld [smem:[#allocation6 + $0xa]]  ;;  %s1600_s12 = smov 104  }
  0x23   :  { %v113_v48 = vadd.f32 %v112_v40, %v111_v33  ;;  %v125_v49 = vadd.f32 %v124_v41, %v123_v34  ;;  %v168_v58 = vld.sshfl [vmem:[#allocation1 + $0x20] sm:$0xff pattern:$0x75316420]  ;;  %v169_v62 = vld.sshfl [vmem:[#allocation1 + $0x28] sm:$0xff pattern:$0x75316420]  ;;  %v179_v63 = vmax.f32 %v177_v42, %v178_v55 }
  0x24   :  { %v120_v51 = vadd.f32 %v119_v46, %v118_v38  ;;  %v136_v52 = vrot.slane %v100_v44, 7  ;;  %v137_v53 = vrot.slane %v108_v45, 6  ;;  %v185_v0 = vrot.slane %v184_v59, 4  ;;  %254 = vst.msk [vmem:[#allocation4 + $0x10] sm:$0xf] %vm252_vm7, %v1592_v4  ;;  %s1387_s11 = sld [smem:[#allocation6 + $0xb]] }
  0x25   :  { %v114_v56 = vrot.slane %v113_v48, 1  ;;  %v126_v57 = vrot.slane %v125_v49, 2  ;;  %v191_v6 = vsel %vm101_vm2, %v163_v54, -inf  ;;  %v170_v9 = vld.sshfl [vmem:[#allocation1 + $0x30] sm:$0xff pattern:$0x75316420] }
  0x26   :  { %v121_v60 = vrot.slane %v120_v51, 1  ;;  %v141_v61 = vsel %vm140_vm3, %v93_v43, %v136_v52  ;;  %v180_v10 = vrot.slane %v179_v63, 2  ;;  %v186_v11 = vmax.f32 %v184_v59, %v185_v0  ;;  %v156_v54 = vld [vmem:[#allocation3] sm:$0x7]  ;;  %s1601_s13 = smov 106   ;;  %s1370_s14 = sld [smem:[#allocation6 + $0x33]] }
  0x27   :  { %v115_v1 = vadd.f32 %v114_v56, %v113_v48  ;;  %v127_v2 = vadd.f32 %v126_v57, %v125_v49  ;;  %v143_v5 = vsel %vm2242_vm4, %v141_v61, %v137_v53  ;;  %v192_v13 = vrot.slane %v191_v6, 4  ;;  %s1391_s15 = sld [smem:[#allocation6 + $0xd]]  ;;  %s1602_s16 = smov 105  }
  0x28   :  { %v122_v7 = vadd.f32 %v121_v60, %v120_v51  ;;  %v148_v8 = vadd.f32 %v143_v5, %v61_v47  ;;  %v198_v14 = vsel %vm86_vm1, %v168_v58, -inf  ;;  %v205_v15 = vsel %vm86_vm1, %v169_v62, -inf  ;;  %s1393_s17 = sld [smem:[#allocation6 + $0xe]]  ;;  %s1603_s18 = smov 101  }
  0x29   :  { %v128_v12 = vrot.slane %v127_v2, 1  ;;  %v181_v17 = vmax.f32 %v179_v63, %v180_v10  ;;  %v187_v18 = vrot.slane %v186_v11, 2  ;;  %v199_v19 = vrot.slane %v198_v14, 4  ;;  %v157_v63 = vld [vmem:[#allocation3 + $0x3] sm:$0x7]  ;;  %s1604_s19 = smov 103  }
  0x2a   :  { %v138_v16 = vrot.slane %v122_v7, 7  ;;  %154 = vst.msk [vmem:[#allocation2] sm:$0x7] %vm1669_vm0, %v148_v8  ;;  %v193_v21 = vmax.f32 %v191_v6, %v192_v13  ;;  %v206_v22 = vrot.slane %v205_v15, 4  ;;  %v212_v23 = vsel %vm101_vm2, %v170_v9, -inf  ;;  %s1374_s20 = sld [smem:[#allocation6 + $0x35]] }
  0x2b   :  { %v129_v20 = vadd.f32 %v128_v12, %v127_v2  ;;  %v182_v25 = vrot.slane %v181_v17, 1  ;;  %v188_v26 = vmax.f32 %v186_v11, %v187_v18  ;;  %v200_v27 = vmax.f32 %v198_v14, %v199_v19  ;;  %s1368_s21 = sld [smem:[#allocation6 + $0x32]] }
  0x2c   :  { %v144_v24 = vsel %vm140_vm3, %v115_v1, %v138_v16  ;;  %v194_v30 = vrot.slane %v193_v21, 2  ;;  %v207_v31 = vmax.f32 %v205_v15, %v206_v22  ;;  %v213_v32 = vrot.slane %v212_v23, 4 }
  0x2d   :  { %v139_v29 = vrot.slane %v129_v20, 6  ;;  %v183_v33 = vmax.f32 %v181_v17, %v182_v25  ;;  %v189_v34 = vrot.slane %v188_v26, 1  ;;  %v201_v35 = vrot.slane %v200_v27, 2 }
  0x2e   :  { %v195_v37 = vmax.f32 %v193_v21, %v194_v30  ;;  %v208_v38 = vrot.slane %v207_v31, 2  ;;  %v214_v39 = vmax.f32 %v212_v23, %v213_v32  ;;  %v309_v11 = vstv %s1369_s0  ;;  %s1605_s0 = smov 102  }
  0x2f   :  { %v145_v36 = vsel %vm2242_vm4, %v144_v24, %v139_v29  ;;  %v190_v41 = vmax.f32 %v188_v26, %v189_v34  ;;  %v202_v42 = vmax.f32 %v200_v27, %v201_v35  ;;  %v288_v12 = vstv %s1367_s2  ;;  %s1372_s2 = sld [smem:[#allocation6 + $0x34]] }
  0x30   :  { %v149_v40 = vadd.f32 %v145_v36, %v62_v28  ;;  %v196_v43 = vrot.slane %v195_v37, 1  ;;  %v209_v44 = vmax.f32 %v207_v31, %v208_v38  ;;  %v215_v45 = vrot.slane %v214_v39, 2 }
  0x31   :  { %v242_v46 = vld [vmem:[#allocation2] sm:$0x7]  ;;  %v203_v47 = vrot.slane %v202_v42, 1  ;;  %v225_v48 = vrot.slane %v190_v41, 7  ;;  %v330_v13 = vstv %s1371_s23  ;;  %v393_v19 = vstv %s1377_s24  ;;  %s1606_s23 = smov 100   ;;  %s1380_s24 = sld [smem:[#allocation6 + $0x38]] }
  0x32   :  { %155 = vst.msk [vmem:[#allocation2 + $0x3] sm:$0x7] %vm1669_vm0, %v149_v40  ;;  %v244_v49 = vmul.f32 0.25, %v242_v46  ;;  %v197_v50 = vmax.f32 %v195_v37, %v196_v43  ;;  %v210_v51 = vrot.slane %v209_v44, 1  ;;  %v216_v52 = vmax.f32 %v214_v39, %v215_v45 }
  0x33   :  { %v229_v53 = vsel %vm140_vm3, %v183_v33, %v225_v48  ;;  %v204_v55 = vmax.f32 %v202_v42, %v203_v47  ;;  %v351_v20 = vstv %s1373_s25  ;;  %v372_v21 = vstv %s1375_s26  ;;  %s1376_s25 = sld [smem:[#allocation6 + $0x36]]  ;;  %s1607_s26 = smov 84  }
  0x34   :  { %v211_v56 = vmax.f32 %v209_v44, %v210_v51  ;;  %v217_v57 = vrot.slane %v216_v52, 1  ;;  %v226_v58 = vrot.slane %v197_v50, 6  ;;  %257 = vst [vmem:[#allocation1] ss:$2 sm:$0xff] %v244_v49  ;;  %v456_v25 = vstv %s1383_s29  ;;  %s1378_s29 = sld [smem:[#allocation6 + $0x37]] }
  0x35   :  { %v414_v26 = vstv %s1379_s30  ;;  %v435_v27 = vstv %s1381_s5  ;;  %v519_v31 = vstv %s1389_s8  ;;  %v477_v32 = vstv %s1385_s9  ;;  %s1382_s30 = sld [smem:[#allocation6 + $0x39]] }
  0x36   :  { %v218_v59 = vmax.f32 %v216_v52, %v217_v57  ;;  %v227_v60 = vrot.slane %v211_v56, 7  ;;  %v230_v61 = vsel %vm2242_vm4, %v229_v53, %v226_v58  ;;  %v498_v33 = vstv %s1387_s11  ;;  %s1384_s5 = sld [smem:[#allocation6 + $0x3a]] }
  0x37   :  { %v235_v62 = vmax.f32 %v156_v54, %v230_v61  ;;  %v310_v38 = vstv %s1370_s14  ;;  %v540_v39 = vstv %s1391_s15  ;;  %v561_v40 = vstv %s1393_s17  ;;  %s1392_s8 = sld [smem:[#allocation6 + $0x3e]] }
  0x38   :  { %v228_v0 = vrot.slane %v218_v59, 6  ;;  %v231_v1 = vsel %vm140_vm3, %v204_v55, %v227_v60  ;;  %v352_v44 = vstv %s1374_s20  ;;  %v289_v45 = vstv %s1368_s21  ;;  %s1395_s9 = sld [smem:[#allocation6 + $0xf]] }
  0x39   :  { %v243_v2 = vld [vmem:[#allocation2 + $0x3] sm:$0x7]  ;;  %237 = vst.msk [vmem:[#allocation3] sm:$0x7] %vm1669_vm0, %v235_v62  ;;  %v331_v46 = vstv %s1372_s2  ;;  %v415_v50 = vstv %s1380_s24  ;;  %v373_v51 = vstv %s1376_s25  ;;  %s1394_s11 = sld [smem:[#allocation6 + $0x3f]]  ;;  %s1610_s2 = smov 81  }
  0x3a   :  { %v245_v4 = vmul.f32 0.25, %v243_v2  ;;  %v232_v5 = vsel %vm2242_vm4, %v231_v1, %v228_v0  ;;  %v394_v52 = vstv %s1378_s29  ;;  %s1398_s14 = sld [smem:[#allocation6 + $0x41]]  ;;  %s1611_s24 = smov 80   ;;  %vm384_vm1 = vcmask 1006592  }
  0x3b   :  { %v236_v6 = vmax.f32 %v157_v63, %v232_v5  ;;  %v436_v57 = vstv %s1382_s30  ;;  %s1397_s15 = sld [smem:[#allocation6 + $0x10]]  ;;  %vm405_vm2 = vcmask 998400   ;;  %vm468_vm7 = vcmask 850944  }
  0x3c   :  { %259 = vst [vmem:[#allocation1 + $0x1] ss:$2 sm:$0xff] %v245_v4  ;;  %v457_v58 = vstv %s1384_s5  ;;  %s1401_s17 = sld [smem:[#allocation6 + $0x12]]  ;;  %vm573_vm4 = vcmask 687104  }
  0x3d   :  { %238 = vst.msk [vmem:[#allocation3 + $0x3] sm:$0x7] %vm1669_vm0, %v236_v6  ;;  %v541_v62 = vstv %s1392_s8  ;;  %s1402_s20 = sld [smem:[#allocation6 + $0x43]]  ;;  %s1613_s8 = smov 78  }
  0x3e   :  { %v582_v5 = vstv %s1395_s9  ;;  %s1404_s21 = sld [smem:[#allocation6 + $0x44]]  ;;  %s1614_s9 = smov 62  }
  0x3f   :  { %v562_v6 = vstv %s1394_s11  ;;  %s1407_s25 = sld [smem:[#allocation6 + $0x15]] }
  0x40   :  { %v246_v8 = vld [vmem:[#allocation3] sm:$0x7]  ;;  %s1408_s29 = sld [smem:[#allocation6 + $0x46]] }
  0x41   :  { %s1410_s30 = sld [smem:[#allocation6 + $0x47]] }
  0x42   :  { %s1409_s5 = sld [smem:[#allocation6 + $0x16]] }
  0x43   :  { %v260_v9 = vld [vmem:[#allocation1] sm:$0xff]  ;;  %s1802_s11 = sld [smem:[#allocation6 + $0x18]] }
  0x44   :  { %266 = vst.msk [vmem:[#allocation4 + $0x2] sm:$0x3f] %vm1716_vm11, %v260_v9  ;;  %v247_v10 = vld [vmem:[#allocation3 + $0x3] sm:$0x7] }
  0x45   :  { %269 = vst [vmem:[#allocation1] ss:$2 sm:$0xff] %v246_v8 }
  0x46   :  { %271 = vst [vmem:[#allocation1 + $0x1] ss:$2 sm:$0xff] %v247_v10 }
  0x4b   :  { %v1722_v14 = vld [vmem:[#allocation4] sm:$0xff] }
  0x4c   :  { %v311_v15 = vmul.f32 %v309_v11, %v1722_v14  ;;  %v290_v16 = vmul.f32 %v288_v12, %v1722_v14  ;;  %v332_v17 = vmul.f32 %v330_v13, %v1722_v14  ;;  %v395_v22 = vmul.f32 %v393_v19, %v1722_v14 }
  0x4d   :  { %v272_v18 = vld [vmem:[#allocation1] sm:$0xff]  ;;  %v353_v23 = vmul.f32 %v351_v20, %v1722_v14  ;;  %v374_v24 = vmul.f32 %v372_v21, %v1722_v14  ;;  %v458_v28 = vmul.f32 %v456_v25, %v1722_v14  ;;  %v416_v29 = vmul.f32 %v414_v26, %v1722_v14 }
  0x4e   :  { %315 = vrot.lane.b32.xlu1 %v311_v15, %s1594_s27  ;;  %294 = vrot.lane.b32.xlu0 %v290_v16, %s1595_s28  ;;  %275 = vst.msk [vmem:[#allocation4 + $0xc] sm:$0x3f] %vm1716_vm11, %v272_v18  ;;  %v437_v30 = vmul.f32 %v435_v27, %v1722_v14  ;;  %v521_v34 = vmul.f32 %v519_v31, %v1722_v14  ;;  %v604_v11 = vstv %s1398_s14  ;;  %v603_v12 = vstv %s1397_s15  ;;  %s1804_s14 = sld [smem:[#allocation6 + $0x49]]  ;;  %s1615_s15 = smov 61  }
  0x4f   :  { %336 = vrot.lane.b32.xlu2 %v332_v17, %s1596_s4  ;;  %v479_v35 = vmul.f32 %v477_v32, %v1722_v14  ;;  %v500_v36 = vmul.f32 %v498_v33, %v1722_v14  ;;  %v542_v42 = vmul.f32 %v540_v39, %v1722_v14  ;;  %v563_v43 = vmul.f32 %v561_v40, %v1722_v14 }
  0x50   :  { %v584_v8 = vmul.f32 %v582_v5, %v1722_v14  ;;  %v605_v16 = vmul.f32 %v603_v12, %v1722_v14  ;;  %v645_v18 = vstv %s1401_s17  ;;  %v646_v20 = vstv %s1402_s20  ;;  %s1616_s17 = smov 60   ;;  %s1617_s20 = smov 59  }
  0x51   :  { %v647_v21 = vmul.f32 %v645_v18, %v1722_v14  ;;  %v708_v31 = vstv %s1407_s25  ;;  %v709_v33 = vstv %s1408_s29  ;;  %v730_v39 = vstv %s1410_s30  ;;  %s1619_s25 = smov 57   ;;  %s1620_s29 = smov 56  }
  0x52   :  { %v729_v40 = vstv %s1409_s5  ;;  %s1876_s30 = sld [smem:[#allocation6 + $0x4e]]  ;;  %vm552_vm11 = vcmask 818176  }
  0x53   :  { %s1879_s5 = sld [smem:[#allocation6 + $0x4f]] }
  0x55   :  { %v1749_v37 = vld [vmem:[#allocation4 + $0xa] sm:$0xff] }
  0x56   :  { %399 = vrot.lane.b32.xlu1 %v395_v22, %s1597_s6  ;;  %357 = vrot.lane.b32.xlu0 %v353_v23, %s1598_s7  ;;  %v312_v41 = vmul.f32 %v310_v38, %v1749_v37  ;;  %v354_v47 = vmul.f32 %v352_v44, %v1749_v37  ;;  %v291_v48 = vmul.f32 %v289_v45, %v1749_v37 }
  0x57   :  { %378 = vrot.lane.b32.xlu2 %v374_v24, %s1599_s10  ;;  %v333_v49 = vmul.f32 %v331_v46, %v1749_v37  ;;  %v417_v53 = vmul.f32 %v415_v50, %v1749_v37  ;;  %v375_v54 = vmul.f32 %v373_v51, %v1749_v37  ;;  %v396_v55 = vmul.f32 %v394_v52, %v1749_v37 }
  0x58   :  { %v438_v60 = vmul.f32 %v436_v57, %v1749_v37  ;;  %v459_v61 = vmul.f32 %v457_v58, %v1749_v37  ;;  %v543_v1 = vmul.f32 %v541_v62, %v1749_v37  ;;  %v564_v9 = vmul.f32 %v562_v6, %v1749_v37 }
  0x59   :  { %v606_v15 = vmul.f32 %v604_v11, %v1749_v37  ;;  %v648_v23 = vmul.f32 %v646_v20, %v1749_v37  ;;  %v667_v24 = vstv %s1404_s21  ;;  %v711_v38 = vmul.f32 %v709_v33, %v1749_v37  ;;  %s1838_s21 = sld [smem:[#allocation6 + $0x4b]] }
  0x5a   :  { %v731_v44 = vmul.f32 %v729_v40, %v1722_v14 }
  0x5e   :  { %462 = vrot.lane.b32.xlu1 %v458_v28, %s1600_s12  ;;  %420 = vrot.lane.b32.xlu0 %v416_v29, %s1601_s13  ;;  %v669_v28 = vmul.f32 %v667_v24, %v1749_v37 }
  0x5f   :  { %441 = vrot.lane.b32.xlu2 %v437_v30, %s1602_s16 }
  0x66   :  { %525 = vrot.lane.b32.xlu1 %v521_v34, %s1603_s18  ;;  %483 = vrot.lane.b32.xlu0 %v479_v35, %s1604_s19  ;;  %v710_v35 = vmul.f32 %v708_v31, %v1722_v14 }
  0x67   :  { %504 = vrot.lane.b32.xlu2 %v500_v36, %s1605_s0 }
  0x6e   :  { %317 = vrot.lane.b32.xlu1 %v312_v41, %s1594_s27  ;;  %546 = vrot.lane.b32.xlu0 %v542_v42, %s1606_s23  ;;  %s1386_s27 = sld [smem:[#allocation6 + $0x3b]] }
  0x6f   :  { %567 = vrot.lane.b32.xlu2 %v563_v43, %s1607_s26  ;;  %v732_v43 = vmul.f32 %v730_v39, %v1749_v37 }
  0x74   :  { %v478_v56 = vstv %s1386_s27  ;;  %s1612_s27 = smov 79  }
  0x75   :  { %v480_v59 = vmul.f32 %v478_v56, %v1749_v37 }
  0x76   :  { %359 = vrot.lane.b32.xlu1 %v354_v47, %s1598_s7  ;;  %296 = vrot.lane.b32.xlu0 %v291_v48, %s1595_s28  ;;  %s1388_s28 = sld [smem:[#allocation6 + $0x3c]]  ;;  %v771_v47 = vstv %s1802_s11  ;;  %v1814_v48 = vld [vmem:[#allocation4 + $0x2] sm:$0x3f]  ;;  %s1622_s11 = smov 39  }
  0x77   :  { %338 = vrot.lane.b32.xlu2 %v333_v49, %s1596_s4  ;;  %s1390_s4 = sld [smem:[#allocation6 + $0x3d]]  ;;  %v775_v57 = vmul.f32 %v1814_v48, %v771_v47 }
  0x7c   :  { %v499_v63 = vstv %s1388_s28  ;;  %s1411_s28 = sld [smem:[#allocation6 + $0x17]] }
  0x7d   :  { %v520_v0 = vstv %s1390_s4  ;;  %v501_v2 = vmul.f32 %v499_v63, %v1749_v37  ;;  %s276_s4 = sld [smem:[#allocation6]] }
  0x7e   :  { %422 = vrot.lane.b32.xlu1 %v417_v53, %s1601_s13  ;;  %380 = vrot.lane.b32.xlu0 %v375_v54, %s1599_s10  ;;  %s1396_s13 = sld [smem:[#allocation6 + $0x40]]  ;;  %v522_v4 = vmul.f32 %v520_v0, %v1749_v37  ;;  %v772_v53 = vstv %s1804_s14  ;;  %s1623_s14 = smov 38  }
  0x7f   :  { %401 = vrot.lane.b32.xlu2 %v396_v55, %s1597_s6 }
  0x82   :  { %v750_v41 = vstv %s1411_s28  ;;  %s1621_s28 = smov 40  }
  0x83   :  { %v752_v45 = vmul.f32 %v750_v41, %v1722_v14  ;;  %v278_v46 = vstv %s276_s4  ;;  %s1892_s4 = sld [smem:[#allocation6 + $0x50]] }
  0x84   :  { %v583_v7 = vstv %s1396_s13  ;;  %s1412_s13 = sld [smem:[#allocation6 + $0x48]]  ;;  %v282_v52 = vmul.f32 %v1722_v14, %v278_v46 }
  0x85   :  { %v585_v10 = vmul.f32 %v583_v7, %v1749_v37 }
  0x86   :  { %485 = vrot.lane.b32.xlu1 %v480_v59, %s1604_s19  ;;  %443 = vrot.lane.b32.xlu0 %v438_v60, %s1602_s16  ;;  %s1608_s16 = smov 83   ;;  %s1400_s19 = sld [smem:[#allocation6 + $0x42]]  ;;  %v1826_v59 = vld [vmem:[#allocation4 + $0xc] sm:$0x3f] }
  0x87   :  { %464 = vrot.lane.b32.xlu2 %v459_v61, %s1600_s12  ;;  %s1399_s12 = sld [smem:[#allocation6 + $0x11]]  ;;  %v776_v61 = vmul.f32 %v1826_v59, %v772_v53 }
  0x8a   :  { %v751_v49 = vstv %s1412_s13  ;;  %s1900_s13 = sld [smem:[#allocation6 + $0x20]] }
  0x8b   :  { %v753_v58 = vmul.f32 %v751_v49, %v1749_v37 }
  0x8c   :  { %v625_v19 = vstv %s1400_s19  ;;  %s1820_s19 = sld [smem:[#allocation6 + $0x1a]] }
  0x8d   :  { %v624_v13 = vstv %s1399_s12  ;;  %v627_v22 = vmul.f32 %v625_v19, %v1749_v37  ;;  %s1811_s12 = sld [smem:[#allocation6 + $0x4a]] }
  0x8e   :  { %548 = vrot.lane.b32.xlu1 %v543_v1, %s1606_s23  ;;  %506 = vrot.lane.b32.xlu0 %v501_v2, %s1605_s0  ;;  %v626_v17 = vmul.f32 %v624_v13, %v1722_v14  ;;  %s1403_s0 = sld [smem:[#allocation6 + $0x13]] }
  0x8f   :  { %527 = vrot.lane.b32.xlu2 %v522_v4, %s1603_s18  ;;  %s1609_s18 = smov 82   ;;  %s1405_s23 = sld [smem:[#allocation6 + $0x14]] }
  0x93   :  { %v795_v2 = vstv %s1811_s12  ;;  %s1918_s12 = sld [smem:[#allocation6 + $0x51]] }
  0x94   :  { %v666_v25 = vstv %s1403_s0  ;;  %s1841_s0 = sld [smem:[#allocation6 + $0x4c]]  ;;  %v797_v12 = vmul.f32 %v795_v2, %v1826_v59 }
  0x95   :  { %v687_v26 = vstv %s1405_s23  ;;  %v668_v29 = vmul.f32 %v666_v25, %v1722_v14  ;;  %s1852_s23 = sld [smem:[#allocation6 + $0x4d]] }
  0x96   :  { %588 = vrot.lane.b32.xlu1 %v584_v8, %s1608_s16  ;;  %569 = vrot.lane.b32.xlu0 %v564_v9, %s1607_s26  ;;  %s1406_s26 = sld [smem:[#allocation6 + $0x45]]  ;;  %v689_v30 = vmul.f32 %v687_v26, %v1722_v14  ;;  %v815_v8 = vstv %s1820_s19 }
  0x97   :  { %590 = vrot.lane.b32.xlu2 %v585_v10, %s1608_s16  ;;  %s1816_s16 = sld [smem:[#allocation6 + $0x19]] }
  0x98   :  { %s1932_s19 = sld [smem:[#allocation6 + $0x53]] }
  0x9b   :  { %v858_v41 = vstv %s1852_s23  ;;  %s1958_s23 = sld [smem:[#allocation6 + $0x54]] }
  0x9c   :  { %v688_v32 = vstv %s1406_s26  ;;  %s1860_s26 = sld [smem:[#allocation6 + $0x1d]] }
  0x9d   :  { %v690_v36 = vmul.f32 %v688_v32, %v1749_v37  ;;  %v794_v4 = vstv %s1816_s16  ;;  %s1922_s16 = sld [smem:[#allocation6 + $0x52]] }
  0x9e   :  { %611 = vrot.lane.b32.xlu1 %v606_v15, %s1609_s18  ;;  %609 = vrot.lane.b32.xlu0 %v605_v16, %s1609_s18  ;;  %s1832_s18 = sld [smem:[#allocation6 + $0x1b]]  ;;  %v796_v13 = vmul.f32 %v794_v4, %v1814_v48 }
  0x9f   :  { %630 = vrot.lane.b32.xlu2 %v626_v17, %s1610_s2  ;;  %v817_v17 = vmul.f32 %v815_v8, %v1814_v48 }
  0xa2   :  { %v878_v47 = vstv %s1860_s26  ;;  %s1974_s26 = sld [smem:[#allocation6 + $0x56]] }
  0xa6   :  { %651 = vrot.lane.b32.xlu1 %v647_v21, %s1611_s24  ;;  %632 = vrot.lane.b32.xlu0 %v627_v22, %s1610_s2  ;;  %s1618_s2 = smov 58   ;;  %v836_v22 = vstv %s1832_s18  ;;  %s1625_s18 = smov 36  }
  0xa7   :  { %653 = vrot.lane.b32.xlu2 %v648_v23, %s1611_s24  ;;  %v816_v23 = vstv %s1838_s21  ;;  %s1857_s24 = sld [smem:[#allocation6 + $0x1c]]  ;;  %v838_v31 = vmul.f32 %v836_v22, %v1814_v48 }
  0xa8   :  { %v818_v32 = vmul.f32 %v816_v23, %v1826_v59  ;;  %s1941_s21 = sld [smem:[#allocation6 + $0x23]] }
  0xa9   :  { %v1792_v27 = vpop.permute.xlu2 %336 }
  0xaa   :  { %v340_v60 = vrot.slane %v1792_v27, 2 }
  0xac   :  { %v343_v1 = vsel %vm342_vm14, %v1792_v27, %v340_v60  ;;  %v837_v27 = vstv %s1841_s0  ;;  %s1626_s0 = smov 35  }
  0xae   :  { %674 = vrot.lane.b32.xlu1 %v669_v28, %s1612_s27  ;;  %672 = vrot.lane.b32.xlu0 %v668_v29, %s1612_s27  ;;  %s1871_s27 = sld [smem:[#allocation6 + $0x1e]] }
  0xaf   :  { %693 = vrot.lane.b32.xlu2 %v689_v30, %s1613_s8 }
  0xb1   :  { %v1797_v34 = vpop.permute.xlu2 %378 }
  0xb2   :  { %v382_v9 = vrot.slane %v1797_v34, 2 }
  0xb4   :  { %v385_v19 = vsel %vm384_vm1, %v1797_v34, %v382_v9 }
  0xb6   :  { %714 = vrot.lane.b32.xlu1 %v710_v35, %s1614_s9  ;;  %695 = vrot.lane.b32.xlu0 %v690_v36, %s1613_s8  ;;  %v839_v35 = vmul.f32 %v837_v27, %v1826_v59  ;;  %s1890_s8 = sld [smem:[#allocation6 + $0x31]] }
  0xb7   :  { %716 = vrot.lane.b32.xlu2 %v711_v38, %s1614_s9  ;;  %s1897_s9 = sld [smem:[#allocation6 + $0x1f]] }
  0xb9   :  { %v1806_v42 = vpop.permute.xlu2 %441 }
  0xba   :  { %v445_v28 = vrot.slane %v1806_v42, 2 }
  0xbc   :  { %v448_v38 = vsel %vm447_vm6, %v1806_v42, %v445_v28 }
  0xbe   :  { %737 = vrot.lane.b32.xlu1 %v732_v43, %s1615_s15  ;;  %735 = vrot.lane.b32.xlu0 %v731_v44, %s1615_s15  ;;  %v857_v43 = vstv %s1857_s24  ;;  %s1912_s15 = sld [smem:[#allocation6 + $0x21]] }
  0xbf   :  { %756 = vrot.lane.b32.xlu2 %v752_v45, %s1616_s17  ;;  %s1961_s24 = sld [smem:[#allocation6 + $0x55]] }
  0xc0   :  { %v316_v50 = vpop.permute.xlu1 %315  ;;  %v295_v51 = vpop.permute.xlu0 %294 }
  0xc1   :  { %v319_v54 = vrot.slane %v316_v50, 2  ;;  %v298_v55 = vrot.slane %v295_v51, 2  ;;  %v1822_v56 = vpop.permute.xlu2 %504 }
  0xc2   :  { %v508_v42 = vrot.slane %v1822_v56, 2 }
  0xc3   :  { %v301_v14 = vsel %vm300_vm12, %v295_v51, %v298_v55  ;;  %v322_v63 = vsel %vm321_vm13, %v316_v50, %v319_v54  ;;  %v860_v51 = vmul.f32 %v858_v41, %v1826_v59  ;;  %v880_v55 = vmul.f32 %v878_v47, %v1814_v48 }
  0xc4   :  { %v305_v62 = vadd.f32 %v301_v14, %v282_v52  ;;  %v859_v52 = vmul.f32 %v857_v43, %v1814_v48 }
  0xc6   :  { %v326_v0 = vadd.f32 %v322_v63, %v305_v62  ;;  %779 = vrot.lane.b32.xlu1 %v775_v57, %s1617_s20  ;;  %758 = vrot.lane.b32.xlu0 %v753_v58, %s1616_s17  ;;  %v511_v58 = vsel %vm510_vm9, %v1822_v56, %v508_v42  ;;  %v879_v62 = vstv %s1876_s30  ;;  %s1624_s17 = smov 37   ;;  %s1984_s30 = sld [smem:[#allocation6 + $0x26]] }
  0xc7   :  { %781 = vrot.lane.b32.xlu2 %v776_v61, %s1617_s20  ;;  %v899_v61 = vstv %s1871_s27  ;;  %s1938_s20 = sld [smem:[#allocation6 + $0x22]]  ;;  %s1628_s27 = smov 18  }
  0xc8   :  { %v400_v5 = vpop.permute.xlu1 %399  ;;  %v358_v6 = vpop.permute.xlu0 %357  ;;  %v347_v7 = vadd.f32 %v343_v1, %v326_v0  ;;  %v900_v1 = vstv %s1879_s5  ;;  %s1629_s5 = smov 17  }
  0xc9   :  { %v361_v10 = vrot.slane %v358_v6, 2  ;;  %v1844_v11 = vpop.permute.xlu2 %567  ;;  %v403_v15 = vrot.slane %v400_v5, 2  ;;  %v902_v9 = vmul.f32 %v900_v1, %v1826_v59 }
  0xca   :  { %v571_v2 = vrot.slane %v1844_v11, 2 }
  0xcb   :  { %v364_v16 = vsel %vm363_vm15, %v358_v6, %v361_v10  ;;  %v406_v21 = vsel %vm405_vm2, %v400_v5, %v403_v15  ;;  %v901_v6 = vmul.f32 %v899_v61, %v1814_v48 }
  0xcc   :  { %v368_v18 = vadd.f32 %v364_v16, %v347_v7  ;;  %v881_v7 = vmul.f32 %v879_v62, %v1826_v59  ;;  %v921_v16 = vstv %s1892_s4  ;;  %v1004_v62 = vstv %s1941_s21  ;;  %s2003_s4 = sld [smem:[#allocation6 + $0x58]] }
  0xcd   :  { %s2056_s21 = sld [smem:[#allocation6 + $0x2b]] }
  0xce   :  { %v389_v20 = vadd.f32 %v385_v19, %v368_v18  ;;  %802 = vrot.lane.b32.xlu1 %v797_v12, %s1618_s2  ;;  %800 = vrot.lane.b32.xlu0 %v796_v13, %s1618_s2  ;;  %v574_v12 = vsel %vm573_vm4, %v1844_v11, %v571_v2  ;;  %v279_v13 = vstv %s1890_s8  ;;  %s1953_s2 = sld [smem:[#allocation6 + $0x24]]  ;;  %v1968_v2 = vld [vmem:[#allocation4 + $0x2] sm:$0xff] }
  0xcf   :  { %821 = vrot.lane.b32.xlu2 %v817_v17, %s1619_s25  ;;  %v920_v17 = vstv %s1897_s9  ;;  %v283_v19 = vmul.f32 %v1749_v37, %v279_v13  ;;  %v1979_v13 = vld [vmem:[#allocation4 + $0xc] sm:$0xff]  ;;  %s1995_s8 = sld [smem:[#allocation6 + $0x27]]  ;;  %s1630_s9 = smov 16  }
  0xd0   :  { %v463_v24 = vpop.permute.xlu1 %462  ;;  %v421_v25 = vpop.permute.xlu0 %420  ;;  %v410_v26 = vadd.f32 %v406_v21, %v389_v20  ;;  %v941_v21 = vstv %s1900_s13  ;;  %s2020_s13 = sld [smem:[#allocation6 + $0x28]] }
  0xd1   :  { %v424_v29 = vrot.slane %v421_v25, 2  ;;  %v1863_v30 = vpop.permute.xlu2 %338  ;;  %v466_v33 = vrot.slane %v463_v24, 2  ;;  %v943_v37 = vmul.f32 %v941_v21, %v1814_v48 }
  0xd3   :  { %v427_v34 = vsel %vm426_vm5, %v421_v25, %v424_v29  ;;  %v469_v40 = vsel %vm468_vm7, %v463_v24, %v466_v33  ;;  %v923_v24 = vmul.f32 %v921_v16, %v1826_v59  ;;  %v922_v25 = vmul.f32 %v920_v17, %v1814_v48 }
  0xd4   :  { %v431_v36 = vadd.f32 %v427_v34, %v410_v26  ;;  %v341_v26 = vrot.slane %v1863_v30, 2  ;;  %v962_v34 = vstv %s1912_s15  ;;  %s2023_s15 = sld [smem:[#allocation6 + $0x29]] }
  0xd6   :  { %v452_v39 = vadd.f32 %v448_v38, %v431_v36  ;;  %842 = vrot.lane.b32.xlu1 %v838_v31, %s1620_s29  ;;  %823 = vrot.lane.b32.xlu0 %v818_v32, %s1619_s25  ;;  %v344_v33 = vsel %vm342_vm14, %v1863_v30, %v341_v26  ;;  %s1627_s25 = smov 34   ;;  %vm657_vm14 = vcmask 654336  }
  0xd7   :  { %844 = vrot.lane.b32.xlu2 %v839_v35, %s1620_s29  ;;  %v942_v35 = vstv %s1918_s12  ;;  %s1981_s29 = sld [smem:[#allocation6 + $0x25]]  ;;  %s1632_s12 = smov 14  }
  0xd8   :  { %v526_v44 = vpop.permute.xlu1 %525  ;;  %v484_v45 = vpop.permute.xlu0 %483  ;;  %v473_v46 = vadd.f32 %v469_v40, %v452_v39  ;;  %v963_v40 = vstv %s1922_s16  ;;  %v944_v47 = vmul.f32 %v942_v35, %v1826_v59  ;;  %s2033_s16 = sld [smem:[#allocation6 + $0x2a]] }
  0xd9   :  { %v487_v49 = vrot.slane %v484_v45, 2  ;;  %v1882_v50 = vpop.permute.xlu2 %401  ;;  %v529_v53 = vrot.slane %v526_v44, 2 }
  0xda   :  { %v404_v43 = vrot.slane %v1882_v50, 2 }
  0xdb   :  { %v490_v54 = vsel %vm489_vm8, %v484_v45, %v487_v49  ;;  %v532_v14 = vsel %vm531_vm10, %v526_v44, %v529_v53 }
  0xdc   :  { %v494_v57 = vadd.f32 %v490_v54, %v473_v46  ;;  %v964_v46 = vmul.f32 %v962_v34, %v1814_v48  ;;  %v407_v53 = vsel %vm405_vm2, %v1882_v50, %v404_v43 }
  0xde   :  { %v515_v60 = vadd.f32 %v511_v58, %v494_v57  ;;  %865 = vrot.lane.b32.xlu1 %v860_v51, %s1621_s28  ;;  %863 = vrot.lane.b32.xlu0 %v859_v52, %s1621_s28  ;;  %v965_v51 = vmul.f32 %v963_v40, %v1826_v59  ;;  %v984_v57 = vstv %s1932_s19  ;;  %v983_v58 = vstv %s1938_s20  ;;  %s2000_s28 = sld [smem:[#allocation6 + $0x57]]  ;;  %s1633_s20 = smov 13  }
  0xdf   :  { %884 = vrot.lane.b32.xlu2 %v880_v55, %s1622_s11  ;;  %v985_v1 = vmul.f32 %v983_v58, %v1814_v48  ;;  %s2040_s19 = sld [smem:[#allocation6 + $0x5b]] }
  0xe0   :  { %v318_v63 = vpop.permute.xlu1 %317  ;;  %v547_v56 = vpop.permute.xlu0 %546  ;;  %v536_v0 = vadd.f32 %v532_v14, %v515_v60 }
  0xe1   :  { %v550_v4 = vrot.slane %v547_v56, 2  ;;  %v1903_v5 = vpop.permute.xlu2 %464  ;;  %v320_v11 = vrot.slane %v318_v63, 2 }
  0xe2   :  { %v467_v50 = vrot.slane %v1903_v5, 2 }
  0xe3   :  { %v553_v8 = vsel %vm552_vm11, %v547_v56, %v550_v4  ;;  %v323_v29 = vsel %vm321_vm13, %v318_v63, %v320_v11  ;;  %vm636_vm13 = vcmask 662528  }
  0xe4   :  { %v557_v10 = vadd.f32 %v553_v8, %v536_v0  ;;  %v986_v0 = vmul.f32 %v984_v57, %v1826_v59  ;;  %v1027_v59 = vstv %s1953_s2  ;;  %s2072_s2 = sld [smem:[#allocation6 + $0x2d]] }
  0xe5   :  { %v1029_v11 = vmul.f32 %v1027_v59, %v1968_v2 }
  0xe6   :  { %905 = vrot.lane.b32.xlu1 %v901_v6, %s1623_s14  ;;  %886 = vrot.lane.b32.xlu0 %v881_v7, %s1622_s11  ;;  %v1914_v15 = vadd.f32 %v574_v12, %v557_v10  ;;  %v1008_v7 = vmul.f32 %v1968_v2, %v1004_v62  ;;  %v1005_v12 = vstv %s1958_s23  ;;  %s2016_s11 = sld [smem:[#allocation6 + $0x59]] }
  0xe7   :  { %907 = vrot.lane.b32.xlu2 %v902_v9, %s1623_s14  ;;  %v470_v9 = vsel %vm468_vm7, %v1903_v5, %v467_v50  ;;  %s1631_s14 = smov 15   ;;  %s2076_s23 = sld [smem:[#allocation6 + $0x5d]]  ;;  %vm720_vm7 = vcmask 506880  }
  0xe8   :  { %v360_v18 = vpop.permute.xlu1 %359  ;;  %v297_v20 = vpop.permute.xlu0 %296 }
  0xe9   :  { %v299_v22 = vrot.slane %v297_v20, 2  ;;  %v1924_v23 = vpop.permute.xlu2 %527  ;;  %v362_v31 = vrot.slane %v360_v18, 2 }
  0xeb   :  { %v302_v27 = vsel %vm300_vm12, %v297_v20, %v299_v22  ;;  %v365_v41 = vsel %vm363_vm15, %v360_v18, %v362_v31  ;;  %v1028_v18 = vstv %s1961_s24  ;;  %v1009_v22 = vmul.f32 %v1979_v13, %v1005_v12  ;;  %s2080_s24 = sld [smem:[#allocation6 + $0x5e]] }
  0xec   :  { %v306_v28 = vadd.f32 %v302_v27, %v283_v19  ;;  %v530_v19 = vrot.slane %v1924_v23, 2  ;;  %v1030_v26 = vmul.f32 %v1028_v18, %v1979_v13  ;;  %v1049_v31 = vstv %s1974_s26  ;;  %s2113_s26 = sld [smem:[#allocation6 + $0x30]] }
  0xed   :  { %vm594_vm12 = vcmask 678912  }
  0xee   :  { %v327_v32 = vadd.f32 %v323_v29, %v306_v28  ;;  %928 = vrot.lane.b32.xlu1 %v923_v24, %s1624_s17  ;;  %926 = vrot.lane.b32.xlu0 %v922_v25, %s1624_s17  ;;  %s2037_s17 = sld [smem:[#allocation6 + $0x5a]] }
  0xef   :  { %947 = vrot.lane.b32.xlu2 %v943_v37, %s1625_s18  ;;  %v533_v37 = vsel %vm531_vm10, %v1924_v23, %v530_v19  ;;  %vm785_vm10 = vcmask 482304  }
  0xf0   :  { %v423_v36 = vpop.permute.xlu1 %422  ;;  %v348_v38 = vadd.f32 %v344_v33, %v327_v32  ;;  %v381_v39 = vpop.permute.xlu0 %380  ;;  %v1048_v32 = vstv %s1981_s29  ;;  %s2117_s29 = sld [smem:[#allocation6 + $0x60]] }
  0xf1   :  { %v383_v44 = vrot.slane %v381_v39, 2  ;;  %v1945_v45 = vpop.permute.xlu2 %590  ;;  %v425_v42 = vrot.slane %v423_v36, 2  ;;  %v1050_v43 = vmul.f32 %v1048_v32, %v1968_v2 }
  0xf2   :  { %v369_v30 = vadd.f32 %v365_v41, %v348_v38  ;;  %v593_v23 = vrot.slane %v1945_v45, 2  ;;  %v1051_v41 = vmul.f32 %v1049_v31, %v1979_v13 }
  0xf3   :  { %v386_v49 = vsel %vm384_vm1, %v381_v39, %v383_v44  ;;  %v428_v55 = vsel %vm426_vm5, %v423_v36, %v425_v42  ;;  %v1069_v36 = vstv %s1984_s30  ;;  %vm678_vm5 = vcmask 646144   ;;  %s1636_s30 = smov 119  }
  0xf4   :  { %v390_v52 = vadd.f32 %v386_v49, %v369_v30  ;;  %v596_v49 = vsel %vm594_vm12, %v1945_v45, %v593_v23 }
  0xf6   :  { %v411_v54 = vadd.f32 %v407_v53, %v390_v52  ;;  %968 = vrot.lane.b32.xlu1 %v964_v46, %s1626_s0  ;;  %949 = vrot.lane.b32.xlu0 %v944_v47, %s1625_s18  ;;  %v1071_v46 = vmul.f32 %v1069_v36, %v1968_v2  ;;  %v1090_v52 = vstv %s1995_s8  ;;  %v1070_v53 = vstv %s2000_s28  ;;  %s2052_s18 = sld [smem:[#allocation6 + $0x5c]] }
  0xf7   :  { %970 = vrot.lane.b32.xlu2 %v965_v51, %s1626_s0  ;;  %s2060_s0 = sld [smem:[#allocation6 + $0x2c]] }
  0xf8   :  { %v486_v60 = vpop.permute.xlu1 %485  ;;  %v432_v14 = vadd.f32 %v428_v55, %v411_v54  ;;  %v444_v61 = vpop.permute.xlu0 %443  ;;  %v1091_v55 = vstv %s2003_s4  ;;  %s1639_s4 = smov [#allocation11]  }
  0xf9   :  { %v446_v63 = vrot.slane %v444_v61, 2  ;;  %v1964_v56 = vpop.permute.xlu2 %630  ;;  %v488_v4 = vrot.slane %v486_v60, 2 }
  0xfa   :  { %v634_v45 = vrot.slane %v1964_v56, 2 }
  0xfb   :  { %v449_v6 = vsel %vm447_vm6, %v444_v61, %v446_v63  ;;  %v491_v48 = vsel %vm489_vm8, %v486_v60, %v488_v4  ;;  %v1072_v61 = vmul.f32 %v1070_v53, %v1979_v13  ;;  %v1093_v63 = vmul.f32 %v1091_v55, %v1979_v13 }
  0xfc   :  { %v453_v8 = vadd.f32 %v449_v6, %v432_v14  ;;  %v1092_v14 = vmul.f32 %v1090_v52, %v1968_v2  ;;  %v637_v4 = vsel %vm636_vm13, %v1964_v56, %v634_v45  ;;  %vm699_vm6 = vcmask 637952  }
  0xfd   :  { %vm741_vm8 = vcmask 498688  }
  0xfe   :  { %v474_v10 = vadd.f32 %v470_v9, %v453_v8  ;;  %991 = vrot.lane.b32.xlu1 %v986_v0, %s1627_s25  ;;  %989 = vrot.lane.b32.xlu0 %v985_v1, %s1627_s25  ;;  %v1111_v8 = vstv %s2020_s13  ;;  %s2102_s25 = sld [smem:[#allocation6 + $0x2f]] }
  0xff   :  { %1012 = vrot.lane.b32.xlu2 %v1008_v7, %s1628_s27  ;;  %v1112_v7 = vstv %s2016_s11 }
 0x100   :  { %v549_v16 = vpop.permute.xlu1 %548  ;;  %v495_v17 = vadd.f32 %v491_v48, %v474_v10  ;;  %v507_v5 = vpop.permute.xlu0 %506  ;;  %v1132_v48 = vstv %s2023_s15  ;;  %s1640_s15 = smov 48  }
 0x101   :  { %v509_v20 = vrot.slane %v507_v5, 2  ;;  %v1987_v21 = vpop.permute.xlu2 %653  ;;  %v551_v24 = vrot.slane %v549_v16, 2 }
 0x102   :  { %v656_v59 = vrot.slane %v1987_v21, 2 }
 0x103   :  { %v512_v25 = vsel %vm510_vm9, %v507_v5, %v509_v20  ;;  %v554_v29 = vsel %vm552_vm11, %v549_v16, %v551_v24  ;;  %v1113_v5 = vmul.f32 %v1111_v8, %v1968_v2  ;;  %v1134_v20 = vmul.f32 %v1132_v48, %v1968_v2 }
 0x104   :  { %v516_v27 = vadd.f32 %v512_v25, %v495_v17  ;;  %v1114_v17 = vmul.f32 %v1112_v7, %v1979_v13  ;;  %v659_v24 = vsel %vm657_vm14, %v1987_v21, %v656_v59  ;;  %vm762_vm9 = vcmask 490496  }
 0x105   :  { %vm806_vm11 = vcmask 474112  }
 0x106   :  { %v537_v28 = vadd.f32 %v533_v37, %v516_v27  ;;  %1033 = vrot.lane.b32.xlu1 %v1029_v11, %s1629_s5  ;;  %1014 = vrot.lane.b32.xlu0 %v1009_v22, %s1628_s27  ;;  %v1133_v27 = vstv %s2037_s17  ;;  %s2120_s27 = sld [smem:[#allocation6 + $0x61]] }
 0x107   :  { %1035 = vrot.lane.b32.xlu2 %v1030_v26, %s1629_s5  ;;  %v1153_v26 = vstv %s2033_s16  ;;  %s1637_s5 = smov 118  }
 0x108   :  { %v589_v33 = vpop.permute.xlu1 %588  ;;  %v558_v34 = vadd.f32 %v554_v29, %v537_v28  ;;  %v570_v35 = vpop.permute.xlu0 %569  ;;  %v1154_v29 = vstv %s2040_s19 }
 0x109   :  { %v592_v38 = vrot.slane %v589_v33, 2  ;;  %v572_v39 = vrot.slane %v570_v35, 2  ;;  %v2006_v40 = vpop.permute.xlu2 %693 }
 0x10a   :  { %v697_v21 = vrot.slane %v2006_v40, 2 }
 0x10b   :  { %v595_v44 = vsel %vm594_vm12, %v589_v33, %v592_v38  ;;  %v575_v30 = vsel %vm573_vm4, %v570_v35, %v572_v39  ;;  %vm615_vm4 = vcmask 670720   ;;  %v1135_v35 = vmul.f32 %v1133_v27, %v1979_v13 }
 0x10c   :  { %v599_v47 = vadd.f32 %v595_v44, %v1914_v15  ;;  %v579_v42 = vadd.f32 %v575_v30, %v558_v34  ;;  %v1155_v34 = vmul.f32 %v1153_v26, %v1968_v2  ;;  %v1156_v38 = vmul.f32 %v1154_v29, %v1979_v13 }
 0x10d   :  { %v1174_v30 = vstv %s2052_s18  ;;  %vm827_vm12 = vcmask 465920  }
 0x10e   :  { %1056 = vrot.lane.b32.xlu1 %v1051_v41, %s1630_s9  ;;  %1054 = vrot.lane.b32.xlu0 %v1050_v43, %s1630_s9  ;;  %v600_v51 = vadd.f32 %v596_v49, %v579_v42  ;;  %v700_v43 = vsel %vm699_vm6, %v2006_v40, %v697_v21  ;;  %v1193_v49 = vstv %s2060_s0  ;;  %s1350_s9 = sshll.u32 %s1639_s4, 4  ;;  %s1351_s9 = int_to_ptr.vmem [resolvable:$true] %s1350_s9 }
 0x10f   :  { %1075 = vrot.lane.b32.xlu2 %v1071_v46, %s1631_s14  ;;  %v1173_v46 = vstv %s2056_s21 }
 0x110   :  { %v612_v54 = vpop.permute.xlu1 %611  ;;  %v610_v15 = vpop.permute.xlu0 %609 }
 0x111   :  { %v614_v57 = vrot.slane %v612_v54, 2  ;;  %v613_v58 = vrot.slane %v610_v15, 2  ;;  %v2026_v60 = vpop.permute.xlu2 %716 }
 0x112   :  { %v719_v40 = vrot.slane %v2026_v60, 2 }
 0x113   :  { %v617_v62 = vsel %vm615_vm4, %v612_v54, %v614_v57  ;;  %v616_v50 = vsel %vm615_vm4, %v610_v15, %v613_v58  ;;  %v1176_v54 = vmul.f32 %v1174_v30, %v1979_v13  ;;  %v1175_v15 = vmul.f32 %v1173_v46, %v1968_v2 }
 0x114   :  { %v621_v0 = vadd.f32 %v617_v62, %v600_v51  ;;  %v620_v1 = vadd.f32 %v616_v50, %v599_v47  ;;  %v1195_v57 = vmul.f32 %v1193_v49, %v1968_v2  ;;  %v1213_v50 = vstv %s2072_s2 }
 0x115   :  { %vm848_vm4 = vcmask 457728  }
 0x116   :  { %1096 = vrot.lane.b32.xlu1 %v1092_v14, %s1632_s12  ;;  %1077 = vrot.lane.b32.xlu0 %v1072_v61, %s1631_s14  ;;  %v641_v6 = vadd.f32 %v637_v4, %v620_v1  ;;  %v722_v61 = vsel %vm720_vm7, %v2026_v60, %v719_v40  ;;  %v1214_v4 = vstv %s2080_s24  ;;  %s1352_s14 = sshll.u32 %s2241_s3, 4  ;;  %s1353_s14 = int_to_ptr.hbm [resolvable:$true] %s1352_s14 }
 0x117   :  { %1098 = vrot.lane.b32.xlu2 %v1093_v63, %s1632_s12  ;;  %v1194_v63 = vstv %s2076_s23  ;;  %s1641_s12 = smov 3  }
 0x118   :  { %v652_v9 = vpop.permute.xlu1 %651  ;;  %v633_v10 = vpop.permute.xlu0 %632 }
 0x119   :  { %v655_v56 = vrot.slane %v652_v9, 2  ;;  %v635_v12 = vrot.slane %v633_v10, 2  ;;  %v2043_v16 = vpop.permute.xlu2 %756 }
 0x11a   :  { %v760_v60 = vrot.slane %v2043_v16, 2 }
 0x11b   :  { %v658_v18 = vsel %vm657_vm14, %v652_v9, %v655_v56  ;;  %v638_v19 = vsel %vm636_vm13, %v633_v10, %v635_v12  ;;  %v1215_v9 = vmul.f32 %v1213_v50, %v1968_v2  ;;  %v1196_v10 = vmul.f32 %v1194_v63, %v1979_v13 }
 0x11c   :  { %v662_v11 = vadd.f32 %v658_v18, %v641_v6  ;;  %v642_v22 = vadd.f32 %v638_v19, %v621_v0  ;;  %v1216_v56 = vmul.f32 %v1214_v4, %v1979_v13  ;;  %vm869_vm13 = vcmask 326656  }
 0x11d   :  { %vm890_vm14 = vcmask 318464  }
 0x11e   :  { %1119 = vrot.lane.b32.xlu1 %v1114_v17, %s1633_s20  ;;  %1117 = vrot.lane.b32.xlu0 %v1113_v5, %s1633_s20  ;;  %v663_v25 = vadd.f32 %v659_v24, %v642_v22  ;;  %v763_v5 = vsel %vm762_vm9, %v2043_v16, %v760_v60  ;;  %v1255_v24 = vstv %s2102_s25 }
 0x11f   :  { %1138 = vrot.lane.b32.xlu2 %v1134_v20, %s1591_s22 }
 0x120   :  { %v675_v37 = vpop.permute.xlu1 %674  ;;  %v673_v28 = vpop.permute.xlu0 %672 }
 0x121   :  { %v677_v31 = vrot.slane %v675_v37, 2  ;;  %v676_v32 = vrot.slane %v673_v28, 2  ;;  %v2063_v33 = vpop.permute.xlu2 %781 }
 0x122   :  { %v784_v16 = vrot.slane %v2063_v33, 6 }
 0x123   :  { %v680_v36 = vsel %vm678_vm5, %v675_v37, %v677_v31  ;;  %v679_v23 = vsel %vm678_vm5, %v673_v28, %v676_v32  ;;  %v1257_v31 = vmul.f32 %v1255_v24, %v1968_v2  ;;  %vm911_vm5 = vcmask 310272  }
 0x124   :  { %v684_v39 = vadd.f32 %v680_v36, %v663_v25  ;;  %v683_v41 = vadd.f32 %v679_v23, %v662_v11  ;;  %v1276_v23 = vstv %s2113_s26 }
 0x126   :  { %1159 = vrot.lane.b32.xlu1 %v1155_v34, %s1598_s7  ;;  %1140 = vrot.lane.b32.xlu0 %v1135_v35, %s1591_s22  ;;  %v704_v44 = vadd.f32 %v700_v43, %v683_v41  ;;  %s2094_s22 = sld [smem:[#allocation6 + $0x5f]]  ;;  %v787_v35 = vsel %vm785_vm10, %v784_v16, %v2063_v33  ;;  %v1277_v43 = vstv %s2120_s27  ;;  %v1278_v33 = vmul.f32 %v1276_v23, %v1968_v2 }
 0x127   :  { %1161 = vrot.lane.b32.xlu2 %v1156_v38, %s1598_s7  ;;  %s2098_s7 = sld [smem:[#allocation6 + $0x2e]]  ;;  %v1256_v38 = vstv %s2117_s29 }
 0x128   :  { %v715_v47 = vpop.permute.xlu1 %714  ;;  %v696_v42 = vpop.permute.xlu0 %695 }
 0x129   :  { %v718_v51 = vrot.slane %v715_v47, 2  ;;  %v698_v52 = vrot.slane %v696_v42, 2  ;;  %v2083_v53 = vpop.permute.xlu2 %821 }
 0x12b   :  { %v721_v55 = vsel %vm720_vm7, %v715_v47, %v718_v51  ;;  %v701_v45 = vsel %vm699_vm6, %v696_v42, %v698_v52  ;;  %v1258_v42 = vmul.f32 %v1256_v38, %v1979_v13  ;;  %v1279_v51 = vmul.f32 %v1277_v43, %v1979_v13 }
 0x12c   :  { %v725_v58 = vadd.f32 %v721_v55, %v704_v44  ;;  %v705_v14 = vadd.f32 %v701_v45, %v684_v39  ;;  %v1235_v19 = vstv %s2094_s22  ;;  %v825_v44 = vrot.slane %v2083_v53, 6 }
 0x12d   :  { %v1234_v20 = vstv %s2098_s7  ;;  %v1237_v37 = vmul.f32 %v1235_v19, %v1979_v13  ;;  %vm932_vm6 = vcmask 302080   ;;  %vm953_vm7 = vcmask 293888  }
 0x12e   :  { %1181 = vrot.lane.b32.xlu1 %v1176_v54, %s1599_s10  ;;  %1179 = vrot.lane.b32.xlu0 %v1175_v15, %s1599_s10  ;;  %v726_v62 = vadd.f32 %v722_v61, %v705_v14  ;;  %s1634_s10 = smov 121   ;;  %v1236_v28 = vmul.f32 %v1234_v20, %v1968_v2  ;;  %v828_v15 = vsel %vm827_vm12, %v825_v44, %v2083_v53 }
 0x12f   :  { %1199 = vrot.lane.b32.xlu2 %v1195_v57, %s1597_s6 }
 0x130   :  { %v738_v0 = vpop.permute.xlu1 %737  ;;  %v736_v1 = vpop.permute.xlu0 %735 }
 0x131   :  { %v740_v6 = vrot.slane %v738_v0, 2  ;;  %v739_v7 = vrot.slane %v736_v1, 2  ;;  %v2105_v8 = vpop.permute.xlu2 %844 }
 0x132   :  { %v847_v2 = vrot.slane %v2105_v8, 6 }
 0x133   :  { %v743_v48 = vsel %vm741_vm8, %v738_v0, %v740_v6  ;;  %v742_v59 = vsel %vm741_vm8, %v736_v1, %v739_v7  ;;  %vm974_vm8 = vcmask 285696  }
 0x134   :  { %v747_v12 = vadd.f32 %v743_v48, %v726_v62  ;;  %v746_v17 = vadd.f32 %v742_v59, %v725_v58  ;;  %v850_v53 = vsel %vm848_vm4, %v847_v2, %v2105_v8 }
 0x136   :  { %1219 = vrot.lane.b32.xlu1 %v1215_v9, %s1634_s10  ;;  %1201 = vrot.lane.b32.xlu0 %v1196_v10, %s1597_s6  ;;  %v767_v18 = vadd.f32 %v763_v5, %v746_v17  ;;  %s1635_s6 = smov 120  }
 0x137   :  { %1221 = vrot.lane.b32.xlu2 %v1216_v56, %s1634_s10 }
 0x138   :  { %v780_v11 = vpop.permute.xlu1 %779  ;;  %v759_v22 = vpop.permute.xlu0 %758 }
 0x139   :  { %v783_v25 = vrot.slane %v780_v11, 6  ;;  %v761_v26 = vrot.slane %v759_v22, 2  ;;  %v2123_v27 = vpop.permute.xlu2 %884 }
 0x13a   :  { %v888_v60 = vrot.slane %v2123_v27, 6 }
 0x13b   :  { %v786_v29 = vsel %vm785_vm10, %v783_v25, %v780_v11  ;;  %v764_v21 = vsel %vm762_vm9, %v759_v22, %v761_v26  ;;  %vm995_vm9 = vcmask 277504   ;;  %vm1018_vm10 = vcmask 146432  }
 0x13c   :  { %v790_v32 = vadd.f32 %v786_v29, %v767_v18  ;;  %v768_v34 = vadd.f32 %v764_v21, %v747_v12  ;;  %v891_v12 = vsel %vm890_vm14, %v888_v60, %v2123_v27 }
 0x13e   :  { %1242 = vrot.lane.b32.xlu1 %v1237_v37, %s1635_s6  ;;  %1240 = vrot.lane.b32.xlu0 %v1236_v28, %s1635_s6  ;;  %v791_v36 = vadd.f32 %v787_v35, %v768_v34 }
 0x13f   :  { %1261 = vrot.lane.b32.xlu2 %v1257_v31, %s1636_s30 }
 0x140   :  { %v803_v39 = vpop.permute.xlu1 %802  ;;  %v801_v41 = vpop.permute.xlu0 %800 }
 0x141   :  { %v805_v30 = vrot.slane %v803_v39, 6  ;;  %v804_v46 = vrot.slane %v801_v41, 6  ;;  %v2136_v47 = vpop.permute.xlu2 %907 }
 0x143   :  { %v808_v49 = vsel %vm806_vm11, %v805_v30, %v803_v39  ;;  %v807_v40 = vsel %vm806_vm11, %v804_v46, %v801_v41  ;;  %v910_v39 = vrot.slane %v2136_v47, 6  ;;  %vm1039_vm11 = vcmask 138240  }
 0x144   :  { %v812_v52 = vadd.f32 %v808_v49, %v791_v36  ;;  %v811_v54 = vadd.f32 %v807_v40, %v790_v32 }
 0x145   :  { %v913_v49 = vsel %vm911_vm5, %v910_v39, %v2136_v47 }
 0x146   :  { %1282 = vrot.lane.b32.xlu1 %v1278_v33, %s1637_s5  ;;  %1263 = vrot.lane.b32.xlu0 %v1258_v42, %s1636_s30  ;;  %v832_v55 = vadd.f32 %v828_v15, %v811_v54 }
 0x147   :  { %1284 = vrot.lane.b32.xlu2 %v1279_v51, %s1637_s5 }
 0x148   :  { %v843_v45 = vpop.permute.xlu1 %842  ;;  %v824_v57 = vpop.permute.xlu0 %823 }
 0x149   :  { %v846_v58 = vrot.slane %v843_v45, 6  ;;  %v826_v14 = vrot.slane %v824_v57, 6  ;;  %v2144_v61 = vpop.permute.xlu2 %947 }
 0x14a   :  { %v951_v40 = vrot.slane %v2144_v61, 6 }
 0x14b   :  { %v849_v13 = vsel %vm848_vm4, %v846_v58, %v843_v45  ;;  %v829_v62 = vsel %vm827_vm12, %v826_v14, %v824_v57  ;;  %vm1060_vm12 = vcmask 130048   ;;  %vm1081_vm4 = vcmask 121856  }
 0x14c   :  { %v853_v50 = vadd.f32 %v849_v13, %v832_v55  ;;  %v833_v63 = vadd.f32 %v829_v62, %v812_v52  ;;  %v954_v14 = vsel %vm953_vm7, %v951_v40, %v2144_v61 }
 0x14e   :  { %v854_v0 = vadd.f32 %v850_v53, %v833_v63 }
 0x150   :  { %v866_v1 = vpop.permute.xlu1 %865  ;;  %v864_v4 = vpop.permute.xlu0 %863 }
 0x151   :  { %v868_v6 = vrot.slane %v866_v1, 6  ;;  %v867_v7 = vrot.slane %v864_v4, 6  ;;  %v2149_v9 = vpop.permute.xlu2 %970 }
 0x152   :  { %v973_v13 = vrot.slane %v2149_v9, 6 }
 0x153   :  { %v871_v10 = vsel %vm869_vm13, %v868_v6, %v866_v1  ;;  %v870_v48 = vsel %vm869_vm13, %v867_v7, %v864_v4  ;;  %vm1102_vm13 = vcmask 113664  }
 0x154   :  { %v875_v59 = vadd.f32 %v871_v10, %v854_v0  ;;  %v874_v56 = vadd.f32 %v870_v48, %v853_v50  ;;  %v976_v4 = vsel %vm974_vm8, %v973_v13, %v2149_v9 }
 0x156   :  { %v895_v17 = vadd.f32 %v891_v12, %v874_v56 }
 0x158   :  { %v906_v8 = vpop.permute.xlu1 %905  ;;  %v887_v5 = vpop.permute.xlu0 %886 }
 0x159   :  { %v2153_v18 = vpop.permute.xlu2 %1012  ;;  %v889_v32 = vrot.slane %v887_v5, 6  ;;  %v909_v34 = vrot.slane %v906_v8, 6 }
 0x15a   :  { %v1016_v60 = vrot.slane %v2153_v18, 6 }
 0x15b   :  { %v892_v23 = vsel %vm890_vm14, %v889_v32, %v887_v5  ;;  %v912_v41 = vsel %vm911_vm5, %v909_v34, %v906_v8  ;;  %vm1123_vm14 = vcmask 105472   ;;  %vm1144_vm5 = vcmask 97280  }
 0x15c   :  { %v896_v44 = vadd.f32 %v892_v23, %v875_v59  ;;  %v916_v42 = vadd.f32 %v912_v41, %v895_v17  ;;  %v1019_v9 = vsel %vm1018_vm10, %v1016_v60, %v2153_v18 }
 0x15e   :  { %v917_v54 = vadd.f32 %v913_v49, %v896_v44 }
 0x160   :  { %v929_v19 = vpop.permute.xlu1 %928  ;;  %v927_v20 = vpop.permute.xlu0 %926 }
 0x161   :  { %v2155_v11 = vpop.permute.xlu2 %1035  ;;  %v930_v38 = vrot.slane %v927_v20, 6  ;;  %v931_v43 = vrot.slane %v929_v19, 6 }
 0x162   :  { %v1038_v5 = vrot.slane %v2155_v11, 6 }
 0x163   :  { %v933_v30 = vsel %vm932_vm6, %v930_v38, %v927_v20  ;;  %v934_v51 = vsel %vm932_vm6, %v931_v43, %v929_v19  ;;  %vm1225_vm6 = vcmask 990208  }
 0x164   :  { %v937_v15 = vadd.f32 %v933_v30, %v916_v42  ;;  %v938_v58 = vadd.f32 %v934_v51, %v917_v54  ;;  %v1041_v32 = vsel %vm1039_vm11, %v1038_v5, %v2155_v11 }
 0x166   :  { %v958_v50 = vadd.f32 %v954_v14, %v937_v15 }
 0x168   :  { %v969_v22 = vpop.permute.xlu1 %968  ;;  %v950_v24 = vpop.permute.xlu0 %949 }
 0x169   :  { %v2157_v16 = vpop.permute.xlu2 %1075  ;;  %v952_v46 = vrot.slane %v950_v24, 6  ;;  %v972_v52 = vrot.slane %v969_v22, 6 }
 0x16a   :  { %v1079_v34 = vrot.slane %v2157_v16, 6 }
 0x16b   :  { %v955_v57 = vsel %vm953_vm7, %v952_v46, %v950_v24  ;;  %v975_v47 = vsel %vm974_vm8, %v972_v52, %v969_v22  ;;  %vm1246_vm7 = vcmask 982016  }
 0x16c   :  { %v959_v63 = vadd.f32 %v955_v57, %v938_v58  ;;  %v979_v1 = vadd.f32 %v975_v47, %v958_v50  ;;  %v1082_v11 = vsel %vm1081_vm4, %v1079_v34, %v2157_v16 }
 0x16e   :  { %v980_v61 = vadd.f32 %v976_v4, %v959_v63 }
 0x170   :  { %v992_v25 = vpop.permute.xlu1 %991  ;;  %v990_v26 = vpop.permute.xlu0 %989 }
 0x171   :  { %v2161_v29 = vpop.permute.xlu2 %1098  ;;  %v993_v2 = vrot.slane %v990_v26, 6  ;;  %v994_v62 = vrot.slane %v992_v25, 6 }
 0x172   :  { %v1101_v46 = vrot.slane %v2161_v29, 6 }
 0x173   :  { %v996_v53 = vsel %vm995_vm9, %v993_v2, %v990_v26  ;;  %v997_v6 = vsel %vm995_vm9, %v994_v62, %v992_v25 }
 0x174   :  { %v1000_v48 = vadd.f32 %v996_v53, %v979_v1  ;;  %v1001_v8 = vadd.f32 %v997_v6, %v980_v61 }
 0x176   :  { %v1023_v22 = vadd.f32 %v1019_v9, %v1000_v48 }
 0x178   :  { %v2159_v37 = vpop.permute.xlu1 %1033  ;;  %v1015_v28 = vpop.permute.xlu0 %1014 }
 0x179   :  { %v2167_v31 = vpop.permute.xlu2 %1138  ;;  %v1017_v0 = vrot.slane %v1015_v28, 6  ;;  %v1037_v7 = vrot.slane %v2159_v37, 6 }
 0x17a   :  { %v1142_v15 = vrot.slane %v2167_v31, 6 }
 0x17b   :  { %v1020_v12 = vsel %vm1018_vm10, %v1017_v0, %v1015_v28  ;;  %v1040_v19 = vsel %vm1039_vm11, %v1037_v7, %v2159_v37  ;;  %vm1323_vm11 = vcmask 1042434  }
 0x17c   :  { %v1024_v24 = vadd.f32 %v1020_v12, %v1001_v8  ;;  %v1044_v28 = vadd.f32 %v1040_v19, %v1023_v22 }
 0x17e   :  { %v1045_v37 = vadd.f32 %v1041_v32, %v1024_v24 }
 0x180   :  { %v2163_v27 = vpop.permute.xlu1 %1056  ;;  %v2165_v21 = vpop.permute.xlu0 %1054 }
 0x181   :  { %v2175_v33 = vpop.permute.xlu2 %1161  ;;  %v1058_v17 = vrot.slane %v2165_v21, 6  ;;  %v1059_v20 = vrot.slane %v2163_v27, 6 }
 0x182   :  { %v1164_v50 = vrot.slane %v2175_v33, 2 }
 0x183   :  { %v1061_v25 = vsel %vm1060_vm12, %v1058_v17, %v2165_v21  ;;  %v1062_v18 = vsel %vm1060_vm12, %v1059_v20, %v2163_v27  ;;  %vm1326_vm12 = vcmask 1041409  }
 0x184   :  { %v1065_v38 = vadd.f32 %v1061_v25, %v1044_v28  ;;  %v1066_v44 = vadd.f32 %v1062_v18, %v1045_v37  ;;  %v1166_v6 = vsel %vm363_vm15, %v2175_v33, %v1164_v50 }
 0x186   :  { %v1086_v49 = vadd.f32 %v1082_v11, %v1065_v38 }
 0x188   :  { %v2169_v35 = vpop.permute.xlu1 %1096  ;;  %v2171_v36 = vpop.permute.xlu0 %1077 }
 0x189   :  { %v2188_v10 = vpop.permute.xlu2 %1199  ;;  %v1080_v26 = vrot.slane %v2171_v36, 6  ;;  %v1100_v23 = vrot.slane %v2169_v35, 6 }
 0x18a   :  { %v1203_v7 = vrot.slane %v2188_v10, 2 }
 0x18b   :  { %v1083_v21 = vsel %vm1081_vm4, %v1080_v26, %v2171_v36  ;;  %v1103_v27 = vsel %vm1102_vm13, %v1100_v23, %v2169_v35  ;;  %v1104_v36 = vsel %vm1102_vm13, %v1101_v46, %v2161_v29  ;;  %vm1328_vm4 = vcmask 1043459  }
 0x18c   :  { %v1087_v40 = vadd.f32 %v1083_v21, %v1066_v44  ;;  %v1107_v54 = vadd.f32 %v1103_v27, %v1086_v49  ;;  %v1205_v5 = vsel %vm405_vm2, %v2188_v10, %v1203_v7  ;;  %vm1330_vm13 = vcmask 1042433  }
 0x18e   :  { %v1108_v2 = vadd.f32 %v1104_v36, %v1087_v40 }
 0x190   :  { %v2179_v55 = vpop.permute.xlu1 %1119  ;;  %v1118_v45 = vpop.permute.xlu0 %1117 }
 0x191   :  { %v1121_v43 = vrot.slane %v1118_v45, 6  ;;  %v1222_v30 = vpop.permute.xlu2 %1221  ;;  %v1122_v42 = vrot.slane %v2179_v55, 6 }
 0x192   :  { %v1224_v19 = vrot.slane %v1222_v30, 2 }
 0x193   :  { %v1124_v51 = vsel %vm1123_vm14, %v1121_v43, %v1118_v45  ;;  %v1125_v57 = vsel %vm1123_vm14, %v1122_v42, %v2179_v55  ;;  %v1145_v45 = vsel %vm1144_vm5, %v1142_v15, %v2167_v31  ;;  %vm2247_vm14 = vcmask 1041408  }
 0x194   :  { %v1128_v58 = vadd.f32 %v1124_v51, %v1107_v54  ;;  %v1129_v62 = vadd.f32 %v1125_v57, %v1108_v2  ;;  %v1227_v32 = vsel %vm1225_vm6, %v1222_v30, %v1224_v19  ;;  %v1297_v51 = vstv %s2239_s1  ;;  %s1638_s1 = smov 69  }
 0x196   :  { %v1149_v53 = vadd.f32 %v1145_v45, %v1128_v58 }
 0x198   :  { %v1160_v59 = vpop.permute.xlu1 %1159  ;;  %v1141_v56 = vpop.permute.xlu0 %1140 }
 0x199   :  { %v1143_v52 = vrot.slane %v1141_v56, 6  ;;  %v1163_v16 = vrot.slane %v1160_v59, 2  ;;  %v1262_v1 = vpop.permute.xlu2 %1261 }
 0x19a   :  { %v1265_v34 = vrot.slane %v1262_v1, 2 }
 0x19b   :  { %v1146_v13 = vsel %vm1144_vm5, %v1143_v52, %v1141_v56  ;;  %v1165_v63 = vsel %vm363_vm15, %v1160_v59, %v1163_v16  ;;  %vm1267_vm15 = vcmask 973824   ;;  %vm1339_vm5 = vcmask 564224  }
 0x19c   :  { %v1150_v0 = vadd.f32 %v1146_v13, %v1129_v62  ;;  %v1169_v60 = vadd.f32 %v1165_v63, %v1149_v53  ;;  %v1268_v44 = vsel %vm1267_vm15, %v1262_v1, %v1265_v34 }
 0x19e   :  { %v1170_v48 = vadd.f32 %v1166_v6, %v1150_v0 }
 0x1a0   :  { %v1182_v39 = vpop.permute.xlu1 %1181  ;;  %v1180_v41 = vpop.permute.xlu0 %1179 }
 0x1a1   :  { %v1183_v47 = vrot.slane %v1180_v41, 2  ;;  %v1184_v29 = vrot.slane %v1182_v39, 2  ;;  %v1285_v28 = vpop.permute.xlu2 %1284 }
 0x1a2   :  { %v1287_v10 = vrot.slane %v1285_v28, 2 }
 0x1a3   :  { %v1185_v55 = vsel %vm384_vm1, %v1180_v41, %v1183_v47  ;;  %v1186_v61 = vsel %vm384_vm1, %v1182_v39, %v1184_v29  ;;  %vm1288_vm1 = vcmask 965632  }
 0x1a4   :  { %v1189_v56 = vadd.f32 %v1185_v55, %v1169_v60  ;;  %v1190_v9 = vadd.f32 %v1186_v61, %v1170_v48  ;;  %v1290_v49 = vsel %vm1288_vm1, %v1285_v28, %v1287_v10 }
 0x1a6   :  { %v1209_v22 = vadd.f32 %v1205_v5, %v1189_v56 }
 0x1a8   :  { %v1220_v14 = vpop.permute.xlu1 %1219  ;;  %v1202_v35 = vpop.permute.xlu0 %1201 }
 0x1a9   :  { %v1204_v4 = vrot.slane %v1202_v35, 2  ;;  %v1223_v31 = vrot.slane %v1220_v14, 2 }
 0x1ab   :  { %v1206_v17 = vsel %vm405_vm2, %v1202_v35, %v1204_v4  ;;  %v1226_v33 = vsel %vm1225_vm6, %v1220_v14, %v1223_v31 }
 0x1ac   :  { %v1210_v24 = vadd.f32 %v1206_v17, %v1190_v9  ;;  %v1230_v26 = vadd.f32 %v1226_v33, %v1209_v22 }
 0x1ae   :  { %v1231_v23 = vadd.f32 %v1227_v32, %v1210_v24 }
 0x1b0   :  { %v1243_v59 = vpop.permute.xlu1 %1242  ;;  %v1241_v12 = vpop.permute.xlu0 %1240 }
 0x1b1   :  { %v1244_v8 = vrot.slane %v1241_v12, 2  ;;  %v1245_v20 = vrot.slane %v1243_v59, 2 }
 0x1b3   :  { %v1247_v25 = vsel %vm1246_vm7, %v1241_v12, %v1244_v8  ;;  %v1248_v18 = vsel %vm1246_vm7, %v1243_v59, %v1245_v20 }
 0x1b4   :  { %v1251_v37 = vadd.f32 %v1247_v25, %v1230_v26  ;;  %v1252_v43 = vadd.f32 %v1248_v18, %v1231_v23 }
 0x1b6   :  { %v1272_v27 = vadd.f32 %v1268_v44, %v1251_v37 }
 0x1b8   :  { %v1283_v38 = vpop.permute.xlu1 %1282  ;;  %v1264_v39 = vpop.permute.xlu0 %1263 }
 0x1b9   :  { %v1286_v41 = vrot.slane %v1283_v38, 2  ;;  %v1266_v21 = vrot.slane %v1264_v39, 2 }
 0x1bb   :  { %v1289_v11 = vsel %vm1288_vm1, %v1283_v38, %v1286_v41  ;;  %v1269_v46 = vsel %vm1267_vm15, %v1264_v39, %v1266_v21 }
 0x1bc   :  { %v1273_v42 = vadd.f32 %v1269_v46, %v1252_v43  ;;  %v1293_v40 = vadd.f32 %v1289_v11, %v1272_v27 }
 0x1be   :  { %v1294_v30 = vadd.f32 %v1290_v49, %v1273_v42 }
 0x1c0   :  { %v1295_v52 = vadd.f32 %v1294_v30, %v1293_v40 }
 0x1c2   :  { %v1298_v54 = vadd.f32 %v1297_v51, %v1295_v52 }
 0x1c4   :  { %v1463_v36 = vmul.f32 -1.442695, %v1298_v54 }
 0x1c6   :  { %1518 = vpow2.f32 %v1463_v36 }
 0x1cc   :  { %v1519_v15 = vpop.eup %1518 }
 0x1cd   :  { %v1302_v57 = vadd.f32 1.0, %v1519_v15 }
 0x1cf   :  { %1520 = vrcp.f32 %v1302_v57  ;;  %v1314_v14 = vand.u32 2147483648, %v1302_v57  ;;  %v1312_v13 = vand.u32 2147483647, %v1302_v57  ;;  %vm1308_vm8 = vweird.f32 %v1302_v57 }
 0x1d1   :  { %v1315_v62 = vor.u32 1.1754944e-38, %v1314_v14  ;;  %vm1313_vm10 = vcmp.eq.f32.partialorder %v1312_v13, 8.507059e+37 }
 0x1d5   :  { %v1521_v16 = vpop.eup %1520 }
 0x1d6   :  { %v1304_v2 = vmul.f32 %v1521_v16, %v1302_v57  ;;  %vm1309_vm2 = vweird.f32 %v1521_v16 }
 0x1d7   :  { %vm1310_vm9 = vmor %vm1308_vm8, %vm1309_vm2 }
 0x1d8   :  { %v1305_v58 = vsub.f32 1.0, %v1304_v2 }
 0x1da   :  { %v1306_v35 = vmul.f32 %v1521_v16, %v1305_v58 }
 0x1dc   :  { %v1307_v47 = vadd.f32 %v1521_v16, %v1306_v35 }
 0x1de   :  { %v1311_v45 = vsel %vm1310_vm9, %v1521_v16, %v1307_v47 }
 0x1df   :  { %v1316_v50 = vsel %vm1313_vm10, %v1315_v62, %v1311_v45 }
 0x1e0   :  { %v1319_v63 = vrot.slane %v1316_v50, 1  ;;  %v1320_v29 = vrot.slane %v1316_v50, 2  ;;  %v1321_v53 = vrot.slane %v1316_v50, 3 }
 0x1e2   :  { %v1322_v0 = vsel %vm140_vm3, %v1316_v50, %v1319_v63  ;;  %v1324_v1 = vsel %vm1323_vm11, %v1320_v29, %v1321_v53  ;;  %v1327_v55 = vsel %vm1326_vm12, %v1316_v50, %v1319_v63  ;;  %v1329_v4 = vsel %vm1328_vm4, %v1320_v29, %v1321_v53 }
 0x1e3   :  { %v1325_v60 = vsel %vm2247_vm14, %v1322_v0, %v1324_v1  ;;  %v1331_v6 = vsel %vm1330_vm13, %v1327_v55, %v1329_v4 }
 0x1e4   :  { %1333 = vrot.lane.b32.xlu0 %v1325_v60, %s1638_s1  ;;  %v1332_v7 = vrot.slane %v1331_v6, 1 }
 0x1e6   :  { %1335 = vrot.lane.b32.xlu1 %v1332_v7, %s1638_s1 }
 0x256   :  { %v1334_v61 = vpop.permute.xlu0 %1333 }
 0x257   :  { %v1337_v31 = vrot.slane %v1334_v61, 1 }
 0x258   :  { %v1336_v48 = vpop.permute.xlu1 %1335 }
 0x259   :  { %v1340_v56 = vsel %vm1339_vm5, %v1334_v61, %v1337_v31  ;;  %v1338_v59 = vrot.slane %v1336_v48, 1 }
 0x25a   :  { %1344 = vst.msk [vmem:[#allocation11] sm:$0x7] %vm1669_vm0, %v1340_v56 }
 0x25b   :  { %v1341_v12 = vsel %vm1339_vm5, %v1336_v48, %v1338_v59 }
 0x25c   :  { %1345 = vst.msk [vmem:[#allocation11 + $0x3] sm:$0x7] %vm1669_vm0, %v1341_v12 }
 0x25d   :  { %1358 = dma.vmem_to_hbm [thread:$0]  %s1351_s9, 96, %s1353_s14, [#allocation8], %s1640_s15, %s1640_s15, %s1641_s12  }
 0x25e   :  { %1586 = dma.done.wait [#allocation8], 96  }
 0x25f   :  { %1587 = vsyncadd [#allocation8], 4294967200 }
 0x260   :  { %1363 = vsyncpa [#allocation7], 1 }
 0x261   :  { %1364 = vsyncpa [#allocation8], 1 }
 0x262   :  { %1365 = vsyncpa [#allocation9], 1 }

</bundles_post_ra>
